<compile_context>
chip_gen: v5e
topology: v5e:2x2
jax: 0.10.0
libtpu: 0.0.40
codegen_flags: <defaults>
</compile_context>

<pallas_src>
import jax
import jax.numpy as jnp
from jax import lax
from jax.experimental import pallas as pl
from jax.experimental.pallas import tpu as pltpu

_LN_EPS = 1e-5
_BN_EPS = 1e-5
_NEG_SLOPE = 0.2


def _leaky_relu(v):
    return jnp.where(v >= 0, v, _NEG_SLOPE * v)


def rbfa_kernel(x_ref, pos_ref, batch_ref,
                w1p_ref, geo_ref, wattp_ref, w2p_ref, rowp_ref, b3p_ref,
                mlp1_ref, mlp2_ref, out_ref):
    x = x_ref[...]                                   # (N, H)
    pos = pos_ref[...]                               # (N, 3)
    b_ids = batch_ref[...]                           # (N, 1) int32

    N = x.shape[0]
    B, O = out_ref.shape
    F, HS = wattp_ref.shape
    H = w1p_ref.shape[0] - 1
    FC = geo_ref.shape[1]
    C = FC // F

    # ---- x1 for ALL filters in one MXU matmul: (N,H) @ (H, F*HS) -----------
    w1p = w1p_ref[...]                               # (H+1, F*HS): weights + bias row
    x1_all = jnp.dot(x, w1p[0:H, :],
                     preferred_element_type=jnp.float32) + w1p[H:H + 1, :]   # (N, F*HS)

    # ---- gaussian RBF for ALL filters on the VPU (direct difference) -------
    geo = geo_ref[...]                               # (4, F*C): 3 rows centers^T, 1 row widths
    d0 = pos[:, 0:1] - geo[0:1, :]
    d1 = pos[:, 1:2] - geo[1:2, :]
    d2 = pos[:, 2:3] - geo[2:3, :]
    dist = jnp.sqrt(d0 * d0 + d1 * d1 + d2 * d2)     # (N, F*C)
    widths = geo[3:4, :]
    inv_w2 = 1.0 / (widths * widths)
    rbf_all = jnp.exp(-dist * inv_w2)                # (N, F*C)

    # ---- filter-invariant graph one-hot (hoisted, computed once) -----------
    onehot = (b_ids == lax.broadcasted_iota(jnp.int32, (N, B), 1)
              ).astype(jnp.float32)                  # (N, B)

    # ---- per-graph masked aggregation: ONE matmul per graph ----------------
    # G[b][f*C + c, f'*HS + hs] = sum_n onehot[n,b] * rbf[n,f,c] * x1[n,f',hs]
    # only the f == f' diagonal blocks are used below.
    G = []
    for b in range(B):                               # B is static & tiny
        Rb = rbf_all * onehot[:, b:b + 1]            # (N, F*C)
        Gb = lax.dot_general(Rb, x1_all, (((0,), (0,)), ((), ())),
                             preferred_element_type=jnp.float32)  # (F*C, F*HS)
        G.append(Gb)

    wattp = wattp_ref[...]                           # (F, HS)
    w2p = w2p_ref[...]                               # (F*HS, H)
    rowp = rowp_ref[...]                             # (4F, H): b2 | ln_gamma | ln_beta | w3
    b3p = b3p_ref[...]                               # (1, F)
    mlp1 = mlp1_ref[...]                             # (F+5, O): wm1 | bm1 | bn1(g,b,m,v)
    mlp2 = mlp2_ref[...]                             # (O+5, O): wm2 | bm2 | bn2(g,b,m,v)

    # accumulate gout @ wm1 + bm1 directly (avoids assembling a (B, F) matrix)
    h1 = jnp.zeros((B, O), jnp.float32) + mlp1[F:F + 1, :]

    for f in range(F):                               # F is static & tiny
        watt_f = wattp[f:f + 1, :]                   # (1, HS)
        aggs = []
        for b in range(B):
            feat = G[b][f * C:(f + 1) * C, f * HS:(f + 1) * HS]      # (C, HS)
            logits = jnp.sum(feat * watt_f, axis=1, keepdims=True)   # (C, 1)
            logits = logits - jnp.max(logits, axis=0, keepdims=True)
            e = jnp.exp(logits)
            denom = jnp.sum(e, axis=0, keepdims=True)
            attn = e * pl.reciprocal(denom, approx=True)             # softmax over C
            aggs.append(jnp.sum(attn * feat, axis=0, keepdims=True)) # (1, HS)
        agg_f = jnp.concatenate(aggs, axis=0)                        # (B, HS)

        # x2 -> LeakyReLU -> LayerNorm -> x3
        h = jnp.dot(agg_f, w2p[f * HS:(f + 1) * HS, :],
                    preferred_element_type=jnp.float32) + rowp[f:f + 1, :]   # (B, H)
        h = _leaky_relu(h)
        mu = jnp.mean(h, axis=1, keepdims=True)
        var = jnp.mean((h - mu) ** 2, axis=1, keepdims=True)
        hn = (h - mu) * lax.rsqrt(var + _LN_EPS) * rowp[F + f:F + f + 1, :] \
             + rowp[2 * F + f:2 * F + f + 1, :]
        col = jnp.sum(hn * rowp[3 * F + f:3 * F + f + 1, :],
                      axis=1, keepdims=True) + b3p[0:1, f:f + 1]             # (B, 1)
        h1 = h1 + col * mlp1[f:f + 1, :]                                     # += gout_f * wm1[f]

    # ---- final MLP: BN1 -> LeakyReLU -> (Dropout=id) -> Linear -> BN2 ------
    h1 = (h1 - mlp1[F + 3:F + 4, :]) * lax.rsqrt(mlp1[F + 4:F + 5, :] + _BN_EPS) \
         * mlp1[F + 1:F + 2, :] + mlp1[F + 2:F + 3, :]
    h1 = _leaky_relu(h1)
    h2 = jnp.dot(h1, mlp2[0:O, :],
                 preferred_element_type=jnp.float32) + mlp2[O:O + 1, :]
    h2 = (h2 - mlp2[O + 3:O + 4, :]) * lax.rsqrt(mlp2[O + 4:O + 5, :] + _BN_EPS) \
         * mlp2[O + 1:O + 2, :] + mlp2[O + 2:O + 3, :]
    out_ref[...] = h2


def rbfa_forward(x, pos, batch, params, num_graphs):
    N, H = x.shape
    F, C, _ = params["centers"].shape
    HS = params["w1"].shape[2]
    O = params["wm1"].shape[1]
    B = num_graphs

    batch2d = batch.reshape(N, 1).astype(jnp.int32)

    # ---- host-side parameter packing (layout plumbing only) ----------------
    w1p = jnp.concatenate(
        [jnp.transpose(params["w1"], (1, 0, 2)).reshape(H, F * HS),
         params["b1"].reshape(1, F * HS)], axis=0)                    # (H+1, F*HS)
    geo = jnp.concatenate(
        [jnp.transpose(params["centers"], (2, 0, 1)).reshape(3, F * C),
         params["widths"].reshape(1, F * C)], axis=0)                 # (4, F*C)
    wattp = params["watt"].reshape(F, HS)                             # (F, HS)
    w2p = params["w2"].reshape(F * HS, H)                             # (F*HS, H)
    rowp = jnp.concatenate(
        [params["b2"].reshape(F, H),
         params["ln"][:, 0, :],
         params["ln"][:, 1, :],
         params["w3"].reshape(F, H)], axis=0)                         # (4F, H)
    b3p = params["b3"].reshape(1, F)                                  # (1, F)
    mlp1 = jnp.concatenate([params["wm1"], params["bm1"], params["bn1"]], axis=0)  # (F+5, O)
    mlp2 = jnp.concatenate([params["wm2"], params["bm2"], params["bn2"]], axis=0)  # (O+5, O)

    return pl.pallas_call(
        rbfa_kernel,
        out_shape=jax.ShapeDtypeStruct((B, O), jnp.float32),
        compiler_params=pltpu.CompilerParams(vmem_limit_bytes=32 * 1024 * 1024),
    )(x, pos, batch2d, w1p, geo, wattp, w2p, rowp, b3p, mlp1, mlp2)


def rbfa_reference(x, pos, batch, params, num_graphs):
    """Plain-JAX reference mirroring the PyTorch forward (eval mode)."""
    F = params["centers"].shape[0]
    outs = []
    for f in range(F):
        x1 = x @ params["w1"][f] + params["b1"][f, 0]
        centers = params["centers"][f]
        widths = params["widths"][f, 0]
        diff = pos[:, None, :] - centers[None, :, :]
        dist = jnp.sqrt(jnp.sum(diff ** 2, axis=2))
        rbf = jnp.exp(-dist / widths ** 2)                           # (N, C)
        mul = rbf[:, :, None] * x1[:, None, :]                       # (N, C, HS)
        rbf_feature = jnp.zeros((num_graphs,) + mul.shape[1:],
                                mul.dtype).at[batch].add(mul)        # (B, C, HS)
        w = rbf_feature @ params["watt"][f] + params["batt"][f, 0]   # (B, C, 1)
        a = jax.nn.softmax(w, axis=1)
        agg = jnp.sum(a * rbf_feature, axis=1)                       # (B, HS)
        h = agg @ params["w2"][f] + params["b2"][f, 0]
        h = jnp.where(h >= 0, h, _NEG_SLOPE * h)
        mu = h.mean(axis=1, keepdims=True)
        var = ((h - mu) ** 2).mean(axis=1, keepdims=True)
        hn = (h - mu) / jnp.sqrt(var + _LN_EPS) * params["ln"][f, 0] + params["ln"][f, 1]
        outs.append(hn @ params["w3"][f] + params["b3"][f, 0])       # (B, 1)
    g = jnp.concatenate(outs, axis=1)                                # (B, F)
    h1 = g @ params["wm1"] + params["bm1"][0]
    bn1 = params["bn1"]
    h1 = (h1 - bn1[2]) / jnp.sqrt(bn1[3] + _BN_EPS) * bn1[0] + bn1[1]
    h1 = jnp.where(h1 >= 0, h1, _NEG_SLOPE * h1)
    h2 = h1 @ params["wm2"] + params["bm2"][0]
    bn2 = params["bn2"]
    h2 = (h2 - bn2[2]) / jnp.sqrt(bn2[3] + _BN_EPS) * bn2[0] + bn2[1]
    return h2


def init_params(key, H, HS, C, F, O):
    ks = jax.random.split(key, 24)
    s = 0.1
    p = {}
    p["centers"] = jax.random.normal(ks[0], (F, C, 3))               # nn.Parameter(randn)
    p["widths"] = jnp.ones((F, 1, C))                                # nn.Parameter(ones)
    p["w1"] = s * jax.random.normal(ks[1], (F, H, HS))
    p["b1"] = s * jax.random.normal(ks[2], (F, 1, HS))
    p["watt"] = s * jax.random.normal(ks[3], (F, HS, 1))
    p["batt"] = s * jax.random.normal(ks[4], (F, 1, 1))
    p["w2"] = s * jax.random.normal(ks[5], (F, HS, H))
    p["b2"] = s * jax.random.normal(ks[6], (F, 1, H))
    ln_g = 1.0 + s * jax.random.normal(ks[7], (F, 1, H))
    ln_b = s * jax.random.normal(ks[8], (F, 1, H))
    p["ln"] = jnp.concatenate([ln_g, ln_b], axis=1)                  # (F, 2, H)
    p["w3"] = s * jax.random.normal(ks[9], (F, H, 1))
    p["b3"] = s * jax.random.normal(ks[10], (F, 1, 1))
    p["wm1"] = s * jax.random.normal(ks[11], (F, O))
    p["bm1"] = s * jax.random.normal(ks[12], (1, O))
    p["wm2"] = s * jax.random.normal(ks[13], (O, O))
    p["bm2"] = s * jax.random.normal(ks[14], (1, O))

    def bn(k):
        k1, k2, k3, k4 = jax.random.split(k, 4)
        gamma = 1.0 + s * jax.random.normal(k1, (O,))
        beta = s * jax.random.normal(k2, (O,))
        rmean = s * jax.random.normal(k3, (O,))
        rvar = 1.0 + s * jnp.abs(jax.random.normal(k4, (O,)))
        return jnp.stack([gamma, beta, rmean, rvar], axis=0)         # (4, O)

    p["bn1"] = bn(ks[15])
    p["bn2"] = bn(ks[16])
    return p


if __name__ == "__main__":
    # hidden_size=16, num_kernels=8, n_filters=3, output_dim=4; attention_size=2*hidden
    H, HS, C, F, O = 16, 32, 8, 3, 4
    N, B = 16, 2                                   # 16 nodes over 2 graphs

    key = jax.random.PRNGKey(0)
    kx, kp, kpar = jax.random.split(key, 3)
    x = jax.random.normal(kx, (N, H), dtype=jnp.float32)
    pos = jax.random.normal(kp, (N, 3), dtype=jnp.float32)
    batch = jnp.array([0] * (N // 2) + [1] * (N // 2), dtype=jnp.int32)
    params = init_params(kpar, H, HS, C, F, O)

    out = rbfa_forward(x, pos, batch, params, num_graphs=B)
    out = jax.block_until_ready(out)
    assert out.shape == (B, O)

    ref = rbfa_reference(x, pos, batch, params, B)
    assert jnp.allclose(out, ref, atol=2e-3, rtol=2e-3), (out, ref)

    print("KERNEL_OK")
</pallas_src>

<mosaic_0001>
module attributes {stable_mosaic.version = 11 : i64} {
  func.func @rbfa_kernel(%arg0: memref<16x16xf32, #tpu.memory_space<vmem>>, %arg1: memref<16x3xf32, #tpu.memory_space<vmem>>, %arg2: memref<16x1xi32, #tpu.memory_space<vmem>>, %arg3: memref<17x96xf32, #tpu.memory_space<vmem>>, %arg4: memref<4x24xf32, #tpu.memory_space<vmem>>, %arg5: memref<3x32xf32, #tpu.memory_space<vmem>>, %arg6: memref<96x16xf32, #tpu.memory_space<vmem>>, %arg7: memref<12x16xf32, #tpu.memory_space<vmem>>, %arg8: memref<1x3xf32, #tpu.memory_space<vmem>>, %arg9: memref<8x4xf32, #tpu.memory_space<vmem>>, %arg10: memref<9x4xf32, #tpu.memory_space<vmem>>, %arg11: memref<2x4xf32, #tpu.memory_space<vmem>>) attributes {dimension_semantics = [], scalar_prefetch = 0 : i64, scratch_operands = 0 : i64, tpu.core_type = #tpu.core_type<tc>} {
    %c0 = arith.constant 0 : index
    %c0_0 = arith.constant 0 : index
    %0 = vector.load %arg0[%c0, %c0_0] : memref<16x16xf32, #tpu.memory_space<vmem>>, vector<16x16xf32>
    %c0_1 = arith.constant 0 : index
    %c0_2 = arith.constant 0 : index
    %1 = vector.load %arg1[%c0_1, %c0_2] : memref<16x3xf32, #tpu.memory_space<vmem>>, vector<16x3xf32>
    %c0_3 = arith.constant 0 : index
    %c0_4 = arith.constant 0 : index
    %2 = vector.load %arg2[%c0_3, %c0_4] : memref<16x1xi32, #tpu.memory_space<vmem>>, vector<16x1xi32>
    %c0_5 = arith.constant 0 : index
    %c0_6 = arith.constant 0 : index
    %3 = vector.load %arg3[%c0_5, %c0_6] : memref<17x96xf32, #tpu.memory_space<vmem>>, vector<17x96xf32>
    %4 = vector.extract_strided_slice %3 {offsets = [0, 0], sizes = [16, 96], strides = [1, 1]} : vector<17x96xf32> to vector<16x96xf32>
    %cst = arith.constant dense<0.000000e+00> : vector<16x96xf32>
    %5 = tpu.matmul %0, %4, %cst {dimension_numbers = #tpu.dot_dimension_numbers<[1], [0], [0], [1], [0, 0, 1, 1], [], []>} : vector<16x16xf32>, vector<16x96xf32>, vector<16x96xf32> -> vector<16x96xf32>
    %6 = vector.extract_strided_slice %3 {offsets = [16, 0], sizes = [1, 96], strides = [1, 1]} : vector<17x96xf32> to vector<1x96xf32>
    %7 = vector.broadcast %6 : vector<1x96xf32> to vector<16x96xf32>
    %8 = arith.addf %5, %7 : vector<16x96xf32>
    %c0_7 = arith.constant 0 : index
    %c0_8 = arith.constant 0 : index
    %9 = vector.load %arg4[%c0_7, %c0_8] : memref<4x24xf32, #tpu.memory_space<vmem>>, vector<4x24xf32>
    %10 = vector.extract_strided_slice %1 {offsets = [0, 0], sizes = [16, 1], strides = [1, 1]} : vector<16x3xf32> to vector<16x1xf32>
    %11 = vector.extract_strided_slice %9 {offsets = [0, 0], sizes = [1, 24], strides = [1, 1]} : vector<4x24xf32> to vector<1x24xf32>
    %12 = vector.broadcast %10 : vector<16x1xf32> to vector<16x24xf32>
    %13 = vector.broadcast %11 : vector<1x24xf32> to vector<16x24xf32>
    %14 = arith.subf %12, %13 : vector<16x24xf32>
    %15 = vector.extract_strided_slice %1 {offsets = [0, 1], sizes = [16, 1], strides = [1, 1]} : vector<16x3xf32> to vector<16x1xf32>
    %16 = vector.extract_strided_slice %9 {offsets = [1, 0], sizes = [1, 24], strides = [1, 1]} : vector<4x24xf32> to vector<1x24xf32>
    %17 = vector.broadcast %15 : vector<16x1xf32> to vector<16x24xf32>
    %18 = vector.broadcast %16 : vector<1x24xf32> to vector<16x24xf32>
    %19 = arith.subf %17, %18 : vector<16x24xf32>
    %20 = vector.extract_strided_slice %1 {offsets = [0, 2], sizes = [16, 1], strides = [1, 1]} : vector<16x3xf32> to vector<16x1xf32>
    %21 = vector.extract_strided_slice %9 {offsets = [2, 0], sizes = [1, 24], strides = [1, 1]} : vector<4x24xf32> to vector<1x24xf32>
    %22 = vector.broadcast %20 : vector<16x1xf32> to vector<16x24xf32>
    %23 = vector.broadcast %21 : vector<1x24xf32> to vector<16x24xf32>
    %24 = arith.subf %22, %23 : vector<16x24xf32>
    %25 = arith.mulf %14, %14 : vector<16x24xf32>
    %26 = arith.mulf %19, %19 : vector<16x24xf32>
    %27 = arith.addf %25, %26 : vector<16x24xf32>
    %28 = arith.mulf %24, %24 : vector<16x24xf32>
    %29 = arith.addf %27, %28 : vector<16x24xf32>
    %30 = math.sqrt %29 : vector<16x24xf32>
    %31 = vector.extract_strided_slice %9 {offsets = [3, 0], sizes = [1, 24], strides = [1, 1]} : vector<4x24xf32> to vector<1x24xf32>
    %32 = arith.mulf %31, %31 : vector<1x24xf32>
    %cst_9 = arith.constant 1.000000e+00 : f32
    %33 = vector.broadcast %cst_9 : f32 to vector<1x24xf32>
    %34 = arith.divf %33, %32 : vector<1x24xf32>
    %cst_10 = arith.constant 0.000000e+00 : f32
    %35 = vector.broadcast %cst_10 : f32 to vector<16x24xf32>
    %36 = arith.subf %35, %30 : vector<16x24xf32>
    %37 = vector.broadcast %34 : vector<1x24xf32> to vector<16x24xf32>
    %38 = arith.mulf %36, %37 : vector<16x24xf32>
    %39 = math.exp %38 : vector<16x24xf32>
    %40 = tpu.iota {dimensions = array<i32: 1>} : vector<16x2xi32>
    %41 = vector.broadcast %2 : vector<16x1xi32> to vector<16x2xi32>
    %42 = arith.cmpi eq, %41, %40 : vector<16x2xi32>
    %43 = arith.extui %42 : vector<16x2xi1> to vector<16x2xi32>
    %44 = arith.sitofp %43 : vector<16x2xi32> to vector<16x2xf32>
    %45 = vector.extract_strided_slice %44 {offsets = [0, 0], sizes = [16, 1], strides = [1, 1]} : vector<16x2xf32> to vector<16x1xf32>
    %46 = vector.broadcast %45 : vector<16x1xf32> to vector<16x24xf32>
    %47 = arith.mulf %39, %46 : vector<16x24xf32>
    %cst_11 = arith.constant dense<0.000000e+00> : vector<24x96xf32>
    %48 = tpu.matmul %47, %8, %cst_11 {dimension_numbers = #tpu.dot_dimension_numbers<[0], [0], [1], [1], [0, 1, 1, 1], [], []>} : vector<16x24xf32>, vector<16x96xf32>, vector<24x96xf32> -> vector<24x96xf32>
    %49 = vector.extract_strided_slice %44 {offsets = [0, 1], sizes = [16, 1], strides = [1, 1]} : vector<16x2xf32> to vector<16x1xf32>
    %50 = vector.broadcast %49 : vector<16x1xf32> to vector<16x24xf32>
    %51 = arith.mulf %39, %50 : vector<16x24xf32>
    %cst_12 = arith.constant dense<0.000000e+00> : vector<24x96xf32>
    %52 = tpu.matmul %51, %8, %cst_12 {dimension_numbers = #tpu.dot_dimension_numbers<[0], [0], [1], [1], [0, 1, 1, 1], [], []>} : vector<16x24xf32>, vector<16x96xf32>, vector<24x96xf32> -> vector<24x96xf32>
    %c0_13 = arith.constant 0 : index
    %c0_14 = arith.constant 0 : index
    %53 = vector.load %arg5[%c0_13, %c0_14] : memref<3x32xf32, #tpu.memory_space<vmem>>, vector<3x32xf32>
    %c0_15 = arith.constant 0 : index
    %c0_16 = arith.constant 0 : index
    %54 = vector.load %arg6[%c0_15, %c0_16] : memref<96x16xf32, #tpu.memory_space<vmem>>, vector<96x16xf32>
    %c0_17 = arith.constant 0 : index
    %c0_18 = arith.constant 0 : index
    %55 = vector.load %arg7[%c0_17, %c0_18] : memref<12x16xf32, #tpu.memory_space<vmem>>, vector<12x16xf32>
    %c0_19 = arith.constant 0 : index
    %c0_20 = arith.constant 0 : index
    %56 = vector.load %arg8[%c0_19, %c0_20] : memref<1x3xf32, #tpu.memory_space<vmem>>, vector<1x3xf32>
    %c0_21 = arith.constant 0 : index
    %c0_22 = arith.constant 0 : index
    %57 = vector.load %arg9[%c0_21, %c0_22] : memref<8x4xf32, #tpu.memory_space<vmem>>, vector<8x4xf32>
    %c0_23 = arith.constant 0 : index
    %c0_24 = arith.constant 0 : index
    %58 = vector.load %arg10[%c0_23, %c0_24] : memref<9x4xf32, #tpu.memory_space<vmem>>, vector<9x4xf32>
    %cst_25 = arith.constant 0.000000e+00 : f32
    %59 = vector.broadcast %cst_25 : f32 to vector<2x4xf32>
    %60 = vector.extract_strided_slice %57 {offsets = [3, 0], sizes = [1, 4], strides = [1, 1]} : vector<8x4xf32> to vector<1x4xf32>
    %61 = vector.broadcast %60 : vector<1x4xf32> to vector<2x4xf32>
    %62 = arith.addf %59, %61 : vector<2x4xf32>
    %63 = vector.extract_strided_slice %53 {offsets = [0, 0], sizes = [1, 32], strides = [1, 1]} : vector<3x32xf32> to vector<1x32xf32>
    %64 = vector.extract_strided_slice %48 {offsets = [0, 0], sizes = [8, 32], strides = [1, 1]} : vector<24x96xf32> to vector<8x32xf32>
    %65 = vector.broadcast %63 : vector<1x32xf32> to vector<8x32xf32>
    %66 = arith.mulf %64, %65 : vector<8x32xf32>
    %cst_26 = arith.constant dense<0.000000e+00> : vector<8xf32>
    %67 = vector.multi_reduction <add>, %66, %cst_26 [1] : vector<8x32xf32> to vector<8xf32>
    %68 = vector.shape_cast %67 : vector<8xf32> to vector<8x1xf32>
    %cst_27 = arith.constant dense<0xFF800000> : vector<1xf32>
    %69 = vector.multi_reduction <maximumf>, %68, %cst_27 [0] : vector<8x1xf32> to vector<1xf32>
    %70 = vector.shape_cast %69 : vector<1xf32> to vector<1x1xf32>
    %71 = vector.broadcast %70 : vector<1x1xf32> to vector<8x1xf32>
    %72 = arith.subf %68, %71 : vector<8x1xf32>
    %73 = math.exp %72 : vector<8x1xf32>
    %cst_28 = arith.constant dense<0.000000e+00> : vector<1xf32>
    %74 = vector.multi_reduction <add>, %73, %cst_28 [0] : vector<8x1xf32> to vector<1xf32>
    %75 = vector.shape_cast %74 : vector<1xf32> to vector<1x1xf32>
    %76 = tpu.reciprocal %75 {approx = true} : vector<1x1xf32> -> vector<1x1xf32>
    %77 = vector.broadcast %76 : vector<1x1xf32> to vector<8x1xf32>
    %78 = arith.mulf %73, %77 : vector<8x1xf32>
    %79 = vector.broadcast %78 : vector<8x1xf32> to vector<8x32xf32>
    %80 = arith.mulf %79, %64 : vector<8x32xf32>
    %cst_29 = arith.constant dense<0.000000e+00> : vector<32xf32>
    %81 = vector.multi_reduction <add>, %80, %cst_29 [0] : vector<8x32xf32> to vector<32xf32>
    %82 = vector.shape_cast %81 : vector<32xf32> to vector<1x32xf32>
    %83 = vector.extract_strided_slice %52 {offsets = [0, 0], sizes = [8, 32], strides = [1, 1]} : vector<24x96xf32> to vector<8x32xf32>
    %84 = vector.broadcast %63 : vector<1x32xf32> to vector<8x32xf32>
    %85 = arith.mulf %83, %84 : vector<8x32xf32>
    %cst_30 = arith.constant dense<0.000000e+00> : vector<8xf32>
    %86 = vector.multi_reduction <add>, %85, %cst_30 [1] : vector<8x32xf32> to vector<8xf32>
    %87 = vector.shape_cast %86 : vector<8xf32> to vector<8x1xf32>
    %cst_31 = arith.constant dense<0xFF800000> : vector<1xf32>
    %88 = vector.multi_reduction <maximumf>, %87, %cst_31 [0] : vector<8x1xf32> to vector<1xf32>
    %89 = vector.shape_cast %88 : vector<1xf32> to vector<1x1xf32>
    %90 = vector.broadcast %89 : vector<1x1xf32> to vector<8x1xf32>
    %91 = arith.subf %87, %90 : vector<8x1xf32>
    %92 = math.exp %91 : vector<8x1xf32>
    %cst_32 = arith.constant dense<0.000000e+00> : vector<1xf32>
    %93 = vector.multi_reduction <add>, %92, %cst_32 [0] : vector<8x1xf32> to vector<1xf32>
    %94 = vector.shape_cast %93 : vector<1xf32> to vector<1x1xf32>
    %95 = tpu.reciprocal %94 {approx = true} : vector<1x1xf32> -> vector<1x1xf32>
    %96 = vector.broadcast %95 : vector<1x1xf32> to vector<8x1xf32>
    %97 = arith.mulf %92, %96 : vector<8x1xf32>
    %98 = vector.broadcast %97 : vector<8x1xf32> to vector<8x32xf32>
    %99 = arith.mulf %98, %83 : vector<8x32xf32>
    %cst_33 = arith.constant dense<0.000000e+00> : vector<32xf32>
    %100 = vector.multi_reduction <add>, %99, %cst_33 [0] : vector<8x32xf32> to vector<32xf32>
    %101 = vector.shape_cast %100 : vector<32xf32> to vector<1x32xf32>
    %102 = tpu.concatenate %82, %101 in 0 : vector<1x32xf32>, vector<1x32xf32> -> vector<2x32xf32>
    %103 = vector.extract_strided_slice %54 {offsets = [0, 0], sizes = [32, 16], strides = [1, 1]} : vector<96x16xf32> to vector<32x16xf32>
    %cst_34 = arith.constant dense<0.000000e+00> : vector<2x16xf32>
    %104 = tpu.matmul %102, %103, %cst_34 {dimension_numbers = #tpu.dot_dimension_numbers<[1], [0], [0], [1], [0, 0, 1, 1], [], []>} : vector<2x32xf32>, vector<32x16xf32>, vector<2x16xf32> -> vector<2x16xf32>
    %105 = vector.extract_strided_slice %55 {offsets = [0, 0], sizes = [1, 16], strides = [1, 1]} : vector<12x16xf32> to vector<1x16xf32>
    %106 = vector.broadcast %105 : vector<1x16xf32> to vector<2x16xf32>
    %107 = arith.addf %104, %106 : vector<2x16xf32>
    %cst_35 = arith.constant 0.000000e+00 : f32
    %108 = vector.broadcast %cst_35 : f32 to vector<2x16xf32>
    %109 = arith.cmpf oge, %107, %108 : vector<2x16xf32>
    %cst_36 = arith.constant 2.000000e-01 : f32
    %110 = vector.broadcast %cst_36 : f32 to vector<2x16xf32>
    %111 = arith.mulf %110, %107 : vector<2x16xf32>
    %112 = arith.select %109, %107, %111 : vector<2x16xi1>, vector<2x16xf32>
    %cst_37 = arith.constant dense<0.000000e+00> : vector<2xf32>
    %113 = vector.multi_reduction <add>, %112, %cst_37 [1] : vector<2x16xf32> to vector<2xf32>
    %114 = vector.shape_cast %113 : vector<2xf32> to vector<2x1xf32>
    %cst_38 = arith.constant 1.600000e+01 : f32
    %115 = vector.broadcast %cst_38 : f32 to vector<2x1xf32>
    %116 = arith.divf %114, %115 : vector<2x1xf32>
    %117 = vector.broadcast %116 : vector<2x1xf32> to vector<2x16xf32>
    %118 = arith.subf %112, %117 : vector<2x16xf32>
    %119 = arith.mulf %118, %118 : vector<2x16xf32>
    %cst_39 = arith.constant dense<0.000000e+00> : vector<2xf32>
    %120 = vector.multi_reduction <add>, %119, %cst_39 [1] : vector<2x16xf32> to vector<2xf32>
    %121 = vector.shape_cast %120 : vector<2xf32> to vector<2x1xf32>
    %cst_40 = arith.constant 1.600000e+01 : f32
    %122 = vector.broadcast %cst_40 : f32 to vector<2x1xf32>
    %123 = arith.divf %121, %122 : vector<2x1xf32>
    %124 = vector.broadcast %116 : vector<2x1xf32> to vector<2x16xf32>
    %125 = arith.subf %112, %124 : vector<2x16xf32>
    %cst_41 = arith.constant 9.99999974E-6 : f32
    %126 = vector.broadcast %cst_41 : f32 to vector<2x1xf32>
    %127 = arith.addf %123, %126 : vector<2x1xf32>
    %128 = math.rsqrt %127 : vector<2x1xf32>
    %129 = vector.broadcast %128 : vector<2x1xf32> to vector<2x16xf32>
    %130 = arith.mulf %125, %129 : vector<2x16xf32>
    %131 = vector.extract_strided_slice %55 {offsets = [3, 0], sizes = [1, 16], strides = [1, 1]} : vector<12x16xf32> to vector<1x16xf32>
    %132 = vector.broadcast %131 : vector<1x16xf32> to vector<2x16xf32>
    %133 = arith.mulf %130, %132 : vector<2x16xf32>
    %134 = vector.extract_strided_slice %55 {offsets = [6, 0], sizes = [1, 16], strides = [1, 1]} : vector<12x16xf32> to vector<1x16xf32>
    %135 = vector.broadcast %134 : vector<1x16xf32> to vector<2x16xf32>
    %136 = arith.addf %133, %135 : vector<2x16xf32>
    %137 = vector.extract_strided_slice %55 {offsets = [9, 0], sizes = [1, 16], strides = [1, 1]} : vector<12x16xf32> to vector<1x16xf32>
    %138 = vector.broadcast %137 : vector<1x16xf32> to vector<2x16xf32>
    %139 = arith.mulf %136, %138 : vector<2x16xf32>
    %cst_42 = arith.constant dense<0.000000e+00> : vector<2xf32>
    %140 = vector.multi_reduction <add>, %139, %cst_42 [1] : vector<2x16xf32> to vector<2xf32>
    %141 = vector.shape_cast %140 : vector<2xf32> to vector<2x1xf32>
    %142 = vector.extract_strided_slice %56 {offsets = [0, 0], sizes = [1, 1], strides = [1, 1]} : vector<1x3xf32> to vector<1x1xf32>
    %143 = vector.broadcast %142 : vector<1x1xf32> to vector<2x1xf32>
    %144 = arith.addf %141, %143 : vector<2x1xf32>
    %145 = vector.extract_strided_slice %57 {offsets = [0, 0], sizes = [1, 4], strides = [1, 1]} : vector<8x4xf32> to vector<1x4xf32>
    %146 = vector.broadcast %144 : vector<2x1xf32> to vector<2x4xf32>
    %147 = vector.broadcast %145 : vector<1x4xf32> to vector<2x4xf32>
    %148 = arith.mulf %146, %147 : vector<2x4xf32>
    %149 = arith.addf %62, %148 : vector<2x4xf32>
    %150 = vector.extract_strided_slice %53 {offsets = [1, 0], sizes = [1, 32], strides = [1, 1]} : vector<3x32xf32> to vector<1x32xf32>
    %151 = vector.extract_strided_slice %48 {offsets = [8, 32], sizes = [8, 32], strides = [1, 1]} : vector<24x96xf32> to vector<8x32xf32>
    %152 = vector.broadcast %150 : vector<1x32xf32> to vector<8x32xf32>
    %153 = arith.mulf %151, %152 : vector<8x32xf32>
    %cst_43 = arith.constant dense<0.000000e+00> : vector<8xf32>
    %154 = vector.multi_reduction <add>, %153, %cst_43 [1] : vector<8x32xf32> to vector<8xf32>
    %155 = vector.shape_cast %154 : vector<8xf32> to vector<8x1xf32>
    %cst_44 = arith.constant dense<0xFF800000> : vector<1xf32>
    %156 = vector.multi_reduction <maximumf>, %155, %cst_44 [0] : vector<8x1xf32> to vector<1xf32>
    %157 = vector.shape_cast %156 : vector<1xf32> to vector<1x1xf32>
    %158 = vector.broadcast %157 : vector<1x1xf32> to vector<8x1xf32>
    %159 = arith.subf %155, %158 : vector<8x1xf32>
    %160 = math.exp %159 : vector<8x1xf32>
    %cst_45 = arith.constant dense<0.000000e+00> : vector<1xf32>
    %161 = vector.multi_reduction <add>, %160, %cst_45 [0] : vector<8x1xf32> to vector<1xf32>
    %162 = vector.shape_cast %161 : vector<1xf32> to vector<1x1xf32>
    %163 = tpu.reciprocal %162 {approx = true} : vector<1x1xf32> -> vector<1x1xf32>
    %164 = vector.broadcast %163 : vector<1x1xf32> to vector<8x1xf32>
    %165 = arith.mulf %160, %164 : vector<8x1xf32>
    %166 = vector.broadcast %165 : vector<8x1xf32> to vector<8x32xf32>
    %167 = arith.mulf %166, %151 : vector<8x32xf32>
    %cst_46 = arith.constant dense<0.000000e+00> : vector<32xf32>
    %168 = vector.multi_reduction <add>, %167, %cst_46 [0] : vector<8x32xf32> to vector<32xf32>
    %169 = vector.shape_cast %168 : vector<32xf32> to vector<1x32xf32>
    %170 = vector.extract_strided_slice %52 {offsets = [8, 32], sizes = [8, 32], strides = [1, 1]} : vector<24x96xf32> to vector<8x32xf32>
    %171 = vector.broadcast %150 : vector<1x32xf32> to vector<8x32xf32>
    %172 = arith.mulf %170, %171 : vector<8x32xf32>
    %cst_47 = arith.constant dense<0.000000e+00> : vector<8xf32>
    %173 = vector.multi_reduction <add>, %172, %cst_47 [1] : vector<8x32xf32> to vector<8xf32>
    %174 = vector.shape_cast %173 : vector<8xf32> to vector<8x1xf32>
    %cst_48 = arith.constant dense<0xFF800000> : vector<1xf32>
    %175 = vector.multi_reduction <maximumf>, %174, %cst_48 [0] : vector<8x1xf32> to vector<1xf32>
    %176 = vector.shape_cast %175 : vector<1xf32> to vector<1x1xf32>
    %177 = vector.broadcast %176 : vector<1x1xf32> to vector<8x1xf32>
    %178 = arith.subf %174, %177 : vector<8x1xf32>
    %179 = math.exp %178 : vector<8x1xf32>
    %cst_49 = arith.constant dense<0.000000e+00> : vector<1xf32>
    %180 = vector.multi_reduction <add>, %179, %cst_49 [0] : vector<8x1xf32> to vector<1xf32>
    %181 = vector.shape_cast %180 : vector<1xf32> to vector<1x1xf32>
    %182 = tpu.reciprocal %181 {approx = true} : vector<1x1xf32> -> vector<1x1xf32>
    %183 = vector.broadcast %182 : vector<1x1xf32> to vector<8x1xf32>
    %184 = arith.mulf %179, %183 : vector<8x1xf32>
    %185 = vector.broadcast %184 : vector<8x1xf32> to vector<8x32xf32>
    %186 = arith.mulf %185, %170 : vector<8x32xf32>
    %cst_50 = arith.constant dense<0.000000e+00> : vector<32xf32>
    %187 = vector.multi_reduction <add>, %186, %cst_50 [0] : vector<8x32xf32> to vector<32xf32>
    %188 = vector.shape_cast %187 : vector<32xf32> to vector<1x32xf32>
    %189 = tpu.concatenate %169, %188 in 0 : vector<1x32xf32>, vector<1x32xf32> -> vector<2x32xf32>
    %190 = vector.extract_strided_slice %54 {offsets = [32, 0], sizes = [32, 16], strides = [1, 1]} : vector<96x16xf32> to vector<32x16xf32>
    %cst_51 = arith.constant dense<0.000000e+00> : vector<2x16xf32>
    %191 = tpu.matmul %189, %190, %cst_51 {dimension_numbers = #tpu.dot_dimension_numbers<[1], [0], [0], [1], [0, 0, 1, 1], [], []>} : vector<2x32xf32>, vector<32x16xf32>, vector<2x16xf32> -> vector<2x16xf32>
    %192 = vector.extract_strided_slice %55 {offsets = [1, 0], sizes = [1, 16], strides = [1, 1]} : vector<12x16xf32> to vector<1x16xf32>
    %193 = vector.broadcast %192 : vector<1x16xf32> to vector<2x16xf32>
    %194 = arith.addf %191, %193 : vector<2x16xf32>
    %cst_52 = arith.constant 0.000000e+00 : f32
    %195 = vector.broadcast %cst_52 : f32 to vector<2x16xf32>
    %196 = arith.cmpf oge, %194, %195 : vector<2x16xf32>
    %cst_53 = arith.constant 2.000000e-01 : f32
    %197 = vector.broadcast %cst_53 : f32 to vector<2x16xf32>
    %198 = arith.mulf %197, %194 : vector<2x16xf32>
    %199 = arith.select %196, %194, %198 : vector<2x16xi1>, vector<2x16xf32>
    %cst_54 = arith.constant dense<0.000000e+00> : vector<2xf32>
    %200 = vector.multi_reduction <add>, %199, %cst_54 [1] : vector<2x16xf32> to vector<2xf32>
    %201 = vector.shape_cast %200 : vector<2xf32> to vector<2x1xf32>
    %cst_55 = arith.constant 1.600000e+01 : f32
    %202 = vector.broadcast %cst_55 : f32 to vector<2x1xf32>
    %203 = arith.divf %201, %202 : vector<2x1xf32>
    %204 = vector.broadcast %203 : vector<2x1xf32> to vector<2x16xf32>
    %205 = arith.subf %199, %204 : vector<2x16xf32>
    %206 = arith.mulf %205, %205 : vector<2x16xf32>
    %cst_56 = arith.constant dense<0.000000e+00> : vector<2xf32>
    %207 = vector.multi_reduction <add>, %206, %cst_56 [1] : vector<2x16xf32> to vector<2xf32>
    %208 = vector.shape_cast %207 : vector<2xf32> to vector<2x1xf32>
    %cst_57 = arith.constant 1.600000e+01 : f32
    %209 = vector.broadcast %cst_57 : f32 to vector<2x1xf32>
    %210 = arith.divf %208, %209 : vector<2x1xf32>
    %211 = vector.broadcast %203 : vector<2x1xf32> to vector<2x16xf32>
    %212 = arith.subf %199, %211 : vector<2x16xf32>
    %cst_58 = arith.constant 9.99999974E-6 : f32
    %213 = vector.broadcast %cst_58 : f32 to vector<2x1xf32>
    %214 = arith.addf %210, %213 : vector<2x1xf32>
    %215 = math.rsqrt %214 : vector<2x1xf32>
    %216 = vector.broadcast %215 : vector<2x1xf32> to vector<2x16xf32>
    %217 = arith.mulf %212, %216 : vector<2x16xf32>
    %218 = vector.extract_strided_slice %55 {offsets = [4, 0], sizes = [1, 16], strides = [1, 1]} : vector<12x16xf32> to vector<1x16xf32>
    %219 = vector.broadcast %218 : vector<1x16xf32> to vector<2x16xf32>
    %220 = arith.mulf %217, %219 : vector<2x16xf32>
    %221 = vector.extract_strided_slice %55 {offsets = [7, 0], sizes = [1, 16], strides = [1, 1]} : vector<12x16xf32> to vector<1x16xf32>
    %222 = vector.broadcast %221 : vector<1x16xf32> to vector<2x16xf32>
    %223 = arith.addf %220, %222 : vector<2x16xf32>
    %224 = vector.extract_strided_slice %55 {offsets = [10, 0], sizes = [1, 16], strides = [1, 1]} : vector<12x16xf32> to vector<1x16xf32>
    %225 = vector.broadcast %224 : vector<1x16xf32> to vector<2x16xf32>
    %226 = arith.mulf %223, %225 : vector<2x16xf32>
    %cst_59 = arith.constant dense<0.000000e+00> : vector<2xf32>
    %227 = vector.multi_reduction <add>, %226, %cst_59 [1] : vector<2x16xf32> to vector<2xf32>
    %228 = vector.shape_cast %227 : vector<2xf32> to vector<2x1xf32>
    %229 = vector.extract_strided_slice %56 {offsets = [0, 1], sizes = [1, 1], strides = [1, 1]} : vector<1x3xf32> to vector<1x1xf32>
    %230 = vector.broadcast %229 : vector<1x1xf32> to vector<2x1xf32>
    %231 = arith.addf %228, %230 : vector<2x1xf32>
    %232 = vector.extract_strided_slice %57 {offsets = [1, 0], sizes = [1, 4], strides = [1, 1]} : vector<8x4xf32> to vector<1x4xf32>
    %233 = vector.broadcast %231 : vector<2x1xf32> to vector<2x4xf32>
    %234 = vector.broadcast %232 : vector<1x4xf32> to vector<2x4xf32>
    %235 = arith.mulf %233, %234 : vector<2x4xf32>
    %236 = arith.addf %149, %235 : vector<2x4xf32>
    %237 = vector.extract_strided_slice %53 {offsets = [2, 0], sizes = [1, 32], strides = [1, 1]} : vector<3x32xf32> to vector<1x32xf32>
    %238 = vector.extract_strided_slice %48 {offsets = [16, 64], sizes = [8, 32], strides = [1, 1]} : vector<24x96xf32> to vector<8x32xf32>
    %239 = vector.broadcast %237 : vector<1x32xf32> to vector<8x32xf32>
    %240 = arith.mulf %238, %239 : vector<8x32xf32>
    %cst_60 = arith.constant dense<0.000000e+00> : vector<8xf32>
    %241 = vector.multi_reduction <add>, %240, %cst_60 [1] : vector<8x32xf32> to vector<8xf32>
    %242 = vector.shape_cast %241 : vector<8xf32> to vector<8x1xf32>
    %cst_61 = arith.constant dense<0xFF800000> : vector<1xf32>
    %243 = vector.multi_reduction <maximumf>, %242, %cst_61 [0] : vector<8x1xf32> to vector<1xf32>
    %244 = vector.shape_cast %243 : vector<1xf32> to vector<1x1xf32>
    %245 = vector.broadcast %244 : vector<1x1xf32> to vector<8x1xf32>
    %246 = arith.subf %242, %245 : vector<8x1xf32>
    %247 = math.exp %246 : vector<8x1xf32>
    %cst_62 = arith.constant dense<0.000000e+00> : vector<1xf32>
    %248 = vector.multi_reduction <add>, %247, %cst_62 [0] : vector<8x1xf32> to vector<1xf32>
    %249 = vector.shape_cast %248 : vector<1xf32> to vector<1x1xf32>
    %250 = tpu.reciprocal %249 {approx = true} : vector<1x1xf32> -> vector<1x1xf32>
    %251 = vector.broadcast %250 : vector<1x1xf32> to vector<8x1xf32>
    %252 = arith.mulf %247, %251 : vector<8x1xf32>
    %253 = vector.broadcast %252 : vector<8x1xf32> to vector<8x32xf32>
    %254 = arith.mulf %253, %238 : vector<8x32xf32>
    %cst_63 = arith.constant dense<0.000000e+00> : vector<32xf32>
    %255 = vector.multi_reduction <add>, %254, %cst_63 [0] : vector<8x32xf32> to vector<32xf32>
    %256 = vector.shape_cast %255 : vector<32xf32> to vector<1x32xf32>
    %257 = vector.extract_strided_slice %52 {offsets = [16, 64], sizes = [8, 32], strides = [1, 1]} : vector<24x96xf32> to vector<8x32xf32>
    %258 = vector.broadcast %237 : vector<1x32xf32> to vector<8x32xf32>
    %259 = arith.mulf %257, %258 : vector<8x32xf32>
    %cst_64 = arith.constant dense<0.000000e+00> : vector<8xf32>
    %260 = vector.multi_reduction <add>, %259, %cst_64 [1] : vector<8x32xf32> to vector<8xf32>
    %261 = vector.shape_cast %260 : vector<8xf32> to vector<8x1xf32>
    %cst_65 = arith.constant dense<0xFF800000> : vector<1xf32>
    %262 = vector.multi_reduction <maximumf>, %261, %cst_65 [0] : vector<8x1xf32> to vector<1xf32>
    %263 = vector.shape_cast %262 : vector<1xf32> to vector<1x1xf32>
    %264 = vector.broadcast %263 : vector<1x1xf32> to vector<8x1xf32>
    %265 = arith.subf %261, %264 : vector<8x1xf32>
    %266 = math.exp %265 : vector<8x1xf32>
    %cst_66 = arith.constant dense<0.000000e+00> : vector<1xf32>
    %267 = vector.multi_reduction <add>, %266, %cst_66 [0] : vector<8x1xf32> to vector<1xf32>
    %268 = vector.shape_cast %267 : vector<1xf32> to vector<1x1xf32>
    %269 = tpu.reciprocal %268 {approx = true} : vector<1x1xf32> -> vector<1x1xf32>
    %270 = vector.broadcast %269 : vector<1x1xf32> to vector<8x1xf32>
    %271 = arith.mulf %266, %270 : vector<8x1xf32>
    %272 = vector.broadcast %271 : vector<8x1xf32> to vector<8x32xf32>
    %273 = arith.mulf %272, %257 : vector<8x32xf32>
    %cst_67 = arith.constant dense<0.000000e+00> : vector<32xf32>
    %274 = vector.multi_reduction <add>, %273, %cst_67 [0] : vector<8x32xf32> to vector<32xf32>
    %275 = vector.shape_cast %274 : vector<32xf32> to vector<1x32xf32>
    %276 = tpu.concatenate %256, %275 in 0 : vector<1x32xf32>, vector<1x32xf32> -> vector<2x32xf32>
    %277 = vector.extract_strided_slice %54 {offsets = [64, 0], sizes = [32, 16], strides = [1, 1]} : vector<96x16xf32> to vector<32x16xf32>
    %cst_68 = arith.constant dense<0.000000e+00> : vector<2x16xf32>
    %278 = tpu.matmul %276, %277, %cst_68 {dimension_numbers = #tpu.dot_dimension_numbers<[1], [0], [0], [1], [0, 0, 1, 1], [], []>} : vector<2x32xf32>, vector<32x16xf32>, vector<2x16xf32> -> vector<2x16xf32>
    %279 = vector.extract_strided_slice %55 {offsets = [2, 0], sizes = [1, 16], strides = [1, 1]} : vector<12x16xf32> to vector<1x16xf32>
    %280 = vector.broadcast %279 : vector<1x16xf32> to vector<2x16xf32>
    %281 = arith.addf %278, %280 : vector<2x16xf32>
    %cst_69 = arith.constant 0.000000e+00 : f32
    %282 = vector.broadcast %cst_69 : f32 to vector<2x16xf32>
    %283 = arith.cmpf oge, %281, %282 : vector<2x16xf32>
    %cst_70 = arith.constant 2.000000e-01 : f32
    %284 = vector.broadcast %cst_70 : f32 to vector<2x16xf32>
    %285 = arith.mulf %284, %281 : vector<2x16xf32>
    %286 = arith.select %283, %281, %285 : vector<2x16xi1>, vector<2x16xf32>
    %cst_71 = arith.constant dense<0.000000e+00> : vector<2xf32>
    %287 = vector.multi_reduction <add>, %286, %cst_71 [1] : vector<2x16xf32> to vector<2xf32>
    %288 = vector.shape_cast %287 : vector<2xf32> to vector<2x1xf32>
    %cst_72 = arith.constant 1.600000e+01 : f32
    %289 = vector.broadcast %cst_72 : f32 to vector<2x1xf32>
    %290 = arith.divf %288, %289 : vector<2x1xf32>
    %291 = vector.broadcast %290 : vector<2x1xf32> to vector<2x16xf32>
    %292 = arith.subf %286, %291 : vector<2x16xf32>
    %293 = arith.mulf %292, %292 : vector<2x16xf32>
    %cst_73 = arith.constant dense<0.000000e+00> : vector<2xf32>
    %294 = vector.multi_reduction <add>, %293, %cst_73 [1] : vector<2x16xf32> to vector<2xf32>
    %295 = vector.shape_cast %294 : vector<2xf32> to vector<2x1xf32>
    %cst_74 = arith.constant 1.600000e+01 : f32
    %296 = vector.broadcast %cst_74 : f32 to vector<2x1xf32>
    %297 = arith.divf %295, %296 : vector<2x1xf32>
    %298 = vector.broadcast %290 : vector<2x1xf32> to vector<2x16xf32>
    %299 = arith.subf %286, %298 : vector<2x16xf32>
    %cst_75 = arith.constant 9.99999974E-6 : f32
    %300 = vector.broadcast %cst_75 : f32 to vector<2x1xf32>
    %301 = arith.addf %297, %300 : vector<2x1xf32>
    %302 = math.rsqrt %301 : vector<2x1xf32>
    %303 = vector.broadcast %302 : vector<2x1xf32> to vector<2x16xf32>
    %304 = arith.mulf %299, %303 : vector<2x16xf32>
    %305 = vector.extract_strided_slice %55 {offsets = [5, 0], sizes = [1, 16], strides = [1, 1]} : vector<12x16xf32> to vector<1x16xf32>
    %306 = vector.broadcast %305 : vector<1x16xf32> to vector<2x16xf32>
    %307 = arith.mulf %304, %306 : vector<2x16xf32>
    %308 = vector.extract_strided_slice %55 {offsets = [8, 0], sizes = [1, 16], strides = [1, 1]} : vector<12x16xf32> to vector<1x16xf32>
    %309 = vector.broadcast %308 : vector<1x16xf32> to vector<2x16xf32>
    %310 = arith.addf %307, %309 : vector<2x16xf32>
    %311 = vector.extract_strided_slice %55 {offsets = [11, 0], sizes = [1, 16], strides = [1, 1]} : vector<12x16xf32> to vector<1x16xf32>
    %312 = vector.broadcast %311 : vector<1x16xf32> to vector<2x16xf32>
    %313 = arith.mulf %310, %312 : vector<2x16xf32>
    %cst_76 = arith.constant dense<0.000000e+00> : vector<2xf32>
    %314 = vector.multi_reduction <add>, %313, %cst_76 [1] : vector<2x16xf32> to vector<2xf32>
    %315 = vector.shape_cast %314 : vector<2xf32> to vector<2x1xf32>
    %316 = vector.extract_strided_slice %56 {offsets = [0, 2], sizes = [1, 1], strides = [1, 1]} : vector<1x3xf32> to vector<1x1xf32>
    %317 = vector.broadcast %316 : vector<1x1xf32> to vector<2x1xf32>
    %318 = arith.addf %315, %317 : vector<2x1xf32>
    %319 = vector.extract_strided_slice %57 {offsets = [2, 0], sizes = [1, 4], strides = [1, 1]} : vector<8x4xf32> to vector<1x4xf32>
    %320 = vector.broadcast %318 : vector<2x1xf32> to vector<2x4xf32>
    %321 = vector.broadcast %319 : vector<1x4xf32> to vector<2x4xf32>
    %322 = arith.mulf %320, %321 : vector<2x4xf32>
    %323 = arith.addf %236, %322 : vector<2x4xf32>
    %324 = vector.extract_strided_slice %57 {offsets = [6, 0], sizes = [1, 4], strides = [1, 1]} : vector<8x4xf32> to vector<1x4xf32>
    %325 = vector.broadcast %324 : vector<1x4xf32> to vector<2x4xf32>
    %326 = arith.subf %323, %325 : vector<2x4xf32>
    %327 = vector.extract_strided_slice %57 {offsets = [7, 0], sizes = [1, 4], strides = [1, 1]} : vector<8x4xf32> to vector<1x4xf32>
    %cst_77 = arith.constant 9.99999974E-6 : f32
    %328 = vector.broadcast %cst_77 : f32 to vector<1x4xf32>
    %329 = arith.addf %327, %328 : vector<1x4xf32>
    %330 = math.rsqrt %329 : vector<1x4xf32>
    %331 = vector.broadcast %330 : vector<1x4xf32> to vector<2x4xf32>
    %332 = arith.mulf %326, %331 : vector<2x4xf32>
    %333 = vector.extract_strided_slice %57 {offsets = [4, 0], sizes = [1, 4], strides = [1, 1]} : vector<8x4xf32> to vector<1x4xf32>
    %334 = vector.broadcast %333 : vector<1x4xf32> to vector<2x4xf32>
    %335 = arith.mulf %332, %334 : vector<2x4xf32>
    %336 = vector.extract_strided_slice %57 {offsets = [5, 0], sizes = [1, 4], strides = [1, 1]} : vector<8x4xf32> to vector<1x4xf32>
    %337 = vector.broadcast %336 : vector<1x4xf32> to vector<2x4xf32>
    %338 = arith.addf %335, %337 : vector<2x4xf32>
    %cst_78 = arith.constant 0.000000e+00 : f32
    %339 = vector.broadcast %cst_78 : f32 to vector<2x4xf32>
    %340 = arith.cmpf oge, %338, %339 : vector<2x4xf32>
    %cst_79 = arith.constant 2.000000e-01 : f32
    %341 = vector.broadcast %cst_79 : f32 to vector<2x4xf32>
    %342 = arith.mulf %341, %338 : vector<2x4xf32>
    %343 = arith.select %340, %338, %342 : vector<2x4xi1>, vector<2x4xf32>
    %344 = vector.extract_strided_slice %58 {offsets = [0, 0], sizes = [4, 4], strides = [1, 1]} : vector<9x4xf32> to vector<4x4xf32>
    %cst_80 = arith.constant dense<0.000000e+00> : vector<2x4xf32>
    %345 = tpu.matmul %343, %344, %cst_80 {dimension_numbers = #tpu.dot_dimension_numbers<[1], [0], [0], [1], [0, 0, 1, 1], [], []>} : vector<2x4xf32>, vector<4x4xf32>, vector<2x4xf32> -> vector<2x4xf32>
    %346 = vector.extract_strided_slice %58 {offsets = [4, 0], sizes = [1, 4], strides = [1, 1]} : vector<9x4xf32> to vector<1x4xf32>
    %347 = vector.broadcast %346 : vector<1x4xf32> to vector<2x4xf32>
    %348 = arith.addf %345, %347 : vector<2x4xf32>
    %349 = vector.extract_strided_slice %58 {offsets = [7, 0], sizes = [1, 4], strides = [1, 1]} : vector<9x4xf32> to vector<1x4xf32>
    %350 = vector.broadcast %349 : vector<1x4xf32> to vector<2x4xf32>
    %351 = arith.subf %348, %350 : vector<2x4xf32>
    %352 = vector.extract_strided_slice %58 {offsets = [8, 0], sizes = [1, 4], strides = [1, 1]} : vector<9x4xf32> to vector<1x4xf32>
    %cst_81 = arith.constant 9.99999974E-6 : f32
    %353 = vector.broadcast %cst_81 : f32 to vector<1x4xf32>
    %354 = arith.addf %352, %353 : vector<1x4xf32>
    %355 = math.rsqrt %354 : vector<1x4xf32>
    %356 = vector.broadcast %355 : vector<1x4xf32> to vector<2x4xf32>
    %357 = arith.mulf %351, %356 : vector<2x4xf32>
    %358 = vector.extract_strided_slice %58 {offsets = [5, 0], sizes = [1, 4], strides = [1, 1]} : vector<9x4xf32> to vector<1x4xf32>
    %359 = vector.broadcast %358 : vector<1x4xf32> to vector<2x4xf32>
    %360 = arith.mulf %357, %359 : vector<2x4xf32>
    %361 = vector.extract_strided_slice %58 {offsets = [6, 0], sizes = [1, 4], strides = [1, 1]} : vector<9x4xf32> to vector<1x4xf32>
    %362 = vector.broadcast %361 : vector<1x4xf32> to vector<2x4xf32>
    %363 = arith.addf %360, %362 : vector<2x4xf32>
    %c0_82 = arith.constant 0 : index
    %c0_83 = arith.constant 0 : index
    %364 = vector.load %arg11[%c0_82, %c0_83] : memref<2x4xf32, #tpu.memory_space<vmem>>, vector<2x4xf32>
    tpu.vector_store %arg11[%c0_82, %c0_83], %363 {strides = array<i32>} : memref<2x4xf32, #tpu.memory_space<vmem>>, vector<2x4xf32>,
    return
  }
}

</mosaic_0001>

<bundles_post_ra>
// kernel: tpu_custom_call.1
= control target key start
LH: loop header
LB: loop body
LE: loop exit
PB: predicated region body
PF: predicated region fallthrough
CT: control target
= control target key end

     0   :  { %v991_v2 = vmov 0   ;;  %s1241_s0 = inlined_call_operand.vmem [shape: f32[16,16], index: 0, kind: input, shape index: {}]   ;;  %s1242_s1 = inlined_call_operand.vmem [shape: f32[16,3], index: 1, kind: input, shape index: {}]   ;;  %s1243_s2 = inlined_call_operand.vmem [shape: s32[16,1], index: 2, kind: input, shape index: {}]   ;;  %s1244_s3 = inlined_call_operand.vmem [shape: f32[17,96], index: 3, kind: input, shape index: {}]   ;;  %s1245_s4 = inlined_call_operand.vmem [shape: f32[4,24], index: 4, kind: input, shape index: {}]   ;;  %s1246_s5 = inlined_call_operand.vmem [shape: f32[3,32], index: 5, kind: input, shape index: {}]   ;;  %s1247_s6 = inlined_call_operand.vmem [shape: f32[96,16], index: 6, kind: input, shape index: {}]   ;;  %s1248_s7 = inlined_call_operand.vmem [shape: f32[12,16], index: 7, kind: input, shape index: {}]   ;;  %s1249_s8 = inlined_call_operand.vmem [shape: f32[1,3], index: 8, kind: input, shape index: {}]   ;;  %s1250_s9 = inlined_call_operand.vmem [shape: f32[8,4], index: 9, kind: input, shape index: {}]   ;;  %s1251_s10 = inlined_call_operand.vmem [shape: f32[9,4], index: 10, kind: input, shape index: {}]   ;;  %s1252_s11 = inlined_call_operand.hbm [shape: f32[2,4], index: 11, kind: output, shape index: {}]  }
   0x1   :  { %v43_v0 = vld [vmem:[%s1243_s2] sm:$0xff]  ;;  %903 = vset.pattern.permute.xlu1 %v991_v2  ;;  %901 = vset.pattern.permute.xlu0 %v991_v2  ;;  %v42_v3 = vld [vmem:[%s1242_s1 + $0x8] sm:$0xff] }
   0x2   :  { %v41_v1 = vld [vmem:[%s1242_s1] sm:$0xff]  ;;  %177 = vperm.xlu1 %903, %v43_v0  }
   0x3   :  { %82 = vperm.xlu0 %901, %v41_v1  }
   0x4   :  { %16 = vsyncpa [#allocation3], 0  ;;  %905 = vset.pattern.permute.xlu2 %v991_v2  ;;  %v992_v4 = vmov 2   ;;  %v993_v5 = vmov 1   ;;  %v44_v6 = vld [vmem:[%s1243_s2 + $0x8] sm:$0xff]  ;;  %v174_v7 = vlaneseq  ;;  %v994_v10 = vmov 0.0  }
   0x5   :  { %87 = vperm.xlu2 %905, %v42_v3   ;;  %v79_v18 = vld [vmem:[%s1245_s4] sm:$0xf]  ;;  %vm49_vm10 = vcmask 130048   ;;  %s996_s16 = smov 64   ;;  %vm367_vm11 = vcmask 261120   ;;  %vm536_vm12 = vcmask 523520  }
   0x6   :  { %v175_v8 = vand.u32 127, %v174_v7  ;;  %v90_v19 = vperm.slane %v79_v18, 0  ;;  %v101_v20 = vperm.slane %v79_v18, 1  ;;  %v112_v25 = vperm.slane %v79_v18, 2  ;;  %s868_s4 = sshll.u32 %s1252_s11, 4  ;;  %s869_s4 = int_to_ptr.hbm [resolvable:$true] %s868_s4 }
   0x7   :  { %v149_v41 = vmul.f32 %v79_v18, %v79_v18  ;;  %vm678_vm13 = vcmask 785920   ;;  %vm425_vm14 = vcmask 1040384  }
   0x9   :  { %vm155_vm2 = vweird.f32 %v149_v41  ;;  %v161_v57 = vand.u32 2147483648, %v149_v41  ;;  %v159_v59 = vand.u32 2147483647, %v149_v41 }
   0xa   :  { %904 = vset.pattern.permute.xlu1 %v992_v4 }
   0xb   :  { %902 = vset.pattern.permute.xlu0 %v993_v5  ;;  %105 = vperm.xlu1 %904, %v41_v1   ;;  %v162_v62 = vor.u32 1.1754944e-38, %v161_v57  ;;  %vm160_vm6 = vcmp.eq.f32.partialorder %v159_v59, 8.507059e+37 }
   0xc   :  { %94 = vperm.xlu0 %902, %v41_v1  }
   0xd   :  { %906 = vset.pattern.permute.xlu2 %v993_v5 }
   0xe   :  { %98 = vperm.xlu2 %906, %v42_v3  }
  0x13   :  { %907 = vset.pattern.permute.xlu1 %v991_v2 }
  0x14   :  { %180 = vperm.xlu1 %907, %v44_v6  }
  0x16   :  { %908 = vset.pattern.permute.xlu2 %v992_v4 }
  0x17   :  { %109 = vperm.xlu2 %908, %v42_v3  }
  0x1f   :  { %914 = vset.pattern.permute.xlu2 %v991_v2 }
  0x5f   :  { %v88_v17 = vpop.permute.xlu2 %87 }
  0x60   :  { %v92_v29 = vsub.f32 %v88_v17, %v90_v19  ;;  %v39_v17 = vld [vmem:[%s1241_s0] sm:$0xff] }
  0x62   :  { %v116_v34 = vmul.f32 %v92_v29, %v92_v29 }
  0x68   :  { %v99_v22 = vpop.permute.xlu2 %98 }
  0x69   :  { %v103_v30 = vsub.f32 %v99_v22, %v101_v20  ;;  %v40_v22 = vld [vmem:[%s1241_s0 + $0x8] sm:$0xff] }
  0x6b   :  { %v118_v35 = vmul.f32 %v103_v30, %v103_v30 }
  0x6d   :  { %v120_v38 = vadd.f32 %v118_v35, %v116_v34 }
  0x71   :  { %v110_v31 = vpop.permute.xlu2 %109 }
  0x72   :  { %v114_v36 = vsub.f32 %v110_v31, %v112_v25 }
  0x74   :  { %v178_v9 = vpop.permute.xlu1 %177  ;;  %v122_v39 = vmul.f32 %v114_v36, %v114_v36 }
  0x75   :  { %vm182_vm0 = vcmp.eq.s32.totalorder %v178_v9, %v175_v8  ;;  %v83_v16 = vpop.permute.xlu0 %82 }
  0x76   :  { %v879_v11 = vsel %vm182_vm0, 1.0, %v994_v10  ;;  %v91_v23 = vsub.f32 %v83_v16, %v90_v19  ;;  %v124_v40 = vadd.f32 %v122_v39, %v120_v38  ;;  %v45_v16 = vld [vmem:[%s1244_s3] sm:$0xff]  ;;  %vm454_vm0 = vcmask 123904  }
  0x77   :  { %190 = vperm.xlu1 %907, %v879_v11  }
  0x78   :  { %v115_v26 = vmul.f32 %v91_v23, %v91_v23  ;;  %vm144_vm8 = vcmp.eq.f32.partialorder %v124_v40, inf  ;;  %v147_v6 = vand.u32 2147483648, %v124_v40  ;;  %vm146_vm9 = vcmp.eq.f32.partialorder %v124_v40, 0.0 }
  0x7d   :  { %v106_v12 = vpop.permute.xlu1 %105 }
  0x7e   :  { %v95_v21 = vpop.permute.xlu0 %94  ;;  %v113_v28 = vsub.f32 %v106_v12, %v112_v25 }
  0x7f   :  { %v102_v24 = vsub.f32 %v95_v21, %v101_v20 }
  0x80   :  { %v121_v33 = vmul.f32 %v113_v28, %v113_v28 }
  0x81   :  { %v117_v27 = vmul.f32 %v102_v24, %v102_v24 }
  0x83   :  { %v119_v32 = vadd.f32 %v117_v27, %v115_v26 }
  0x85   :  { %v123_v37 = vadd.f32 %v121_v33, %v119_v32  ;;  %v917_v32 = vld [vmem:[%s1244_s3 + $0x10] ss:$0 sm:$0xff] }
  0x86   :  { %v181_v13 = vpop.permute.xlu1 %180 }
  0x87   :  { %vm183_vm1 = vcmp.eq.s32.totalorder %v181_v13, %v175_v8  ;;  %919 = vrsqrt.f32 %v123_v37  ;;  %vm132_vm5 = vcmp.eq.f32.partialorder %v123_v37, inf  ;;  %v135_v1 = vand.u32 2147483648, %v123_v37 }
  0x88   :  { %v880_v14 = vsel %vm183_vm1, 1.0, %v994_v10  ;;  %921 = vrsqrt.f32 %v124_v40  ;;  %vm134_vm7 = vcmp.eq.f32.partialorder %v123_v37, 0.0 }
  0x89   :  { %v909_v15 = vpack.i.bf16 %v880_v14, %v879_v11  ;;  %195 = vperm.xlu2 %914, %v880_v14   ;;  %923 = vrcp.f32 %v149_v41 }
  0x8b   :  { %910 = vperm.xlu0 %902, %v909_v15   ;;  %v46_v15 = vld [vmem:[%s1244_s3 + $0x8] sm:$0xff]  ;;  %s995_s3 = smov 32  }
  0x8c   :  { %70 = vmatpush.msra.mxu0 %v46_v15 }
  0x8d   :  { %v920_v42 = vpop.eup %919 }
  0x8e   :  { %v126_v43 = vmul.f32 %v920_v42, %v123_v37  ;;  %v922_v44 = vpop.eup %921  ;;  %71 = vmatpush.msra.mxu0 %v45_v16 }
  0x8f   :  { %v924_v46 = vpop.eup %923  ;;  %v138_v47 = vmul.f32 %v922_v44, %v124_v40  ;;  %877 = vmatmul.msk.f32.vlgmr.msra.gmra.mxu0 %vm49_vm10, %v39_v17 }
  0x90   :  { %v127_v45 = vmul.f32 %v920_v42, %v126_v43  ;;  %v151_v48 = vmul.f32 %v924_v46, %v149_v41  ;;  %vm156_vm3 = vweird.f32 %v924_v46 }
  0x91   :  { %915 = vset.pattern.permute.xlu2 %v993_v5  ;;  %v139_v50 = vmul.f32 %v922_v44, %v138_v47  ;;  %vm157_vm4 = vmor %vm155_vm2, %vm156_vm3 }
  0x92   :  { %v128_v49 = vmul.f32 0.5, %v127_v45  ;;  %v152_v51 = vsub.f32 1.0, %v151_v48 }
  0x93   :  { %v140_v53 = vmul.f32 0.5, %v139_v50 }
  0x94   :  { %v129_v52 = vsub.f32 1.5, %v128_v49  ;;  %v153_v54 = vmul.f32 %v924_v46, %v152_v51 }
  0x95   :  { %v141_v56 = vsub.f32 1.5, %v140_v53 }
  0x96   :  { %v130_v55 = vmul.f32 %v920_v42, %v129_v52  ;;  %v154_v58 = vadd.f32 %v924_v46, %v153_v54 }
  0x97   :  { %v142_v61 = vmul.f32 %v922_v44, %v141_v56  ;;  %878 = vmatmul.msk.f32.gmra.mxu0 %vm49_vm10, %v40_v22 }
  0x98   :  { %v131_v60 = vmul.f32 %v130_v55, %v123_v37  ;;  %v158_v63 = vsel %vm157_vm4, %v924_v46, %v154_v58 }
  0x99   :  { %v143_v2 = vmul.f32 %v142_v61, %v124_v40  ;;  %v163_v3 = vsel %vm160_vm6, %v162_v62, %v158_v63 }
  0x9a   :  { %v133_v0 = vsel %vm132_vm5, %v123_v37, %v131_v60  ;;  %v167_v8 = vperm.slane %v163_v3, 3  ;;  %v344_v37 = vld [vmem:[%s1246_s5] sm:$0x7]  ;;  %s997_s5 = smov 96  }
  0x9b   :  { %v136_v5 = vsel %vm134_vm7, %v135_v1, %v133_v0  ;;  %v145_v7 = vsel %vm144_vm8, %v124_v40, %v143_v2  ;;  %v505_v39 = vperm.slane %v344_v37, 1  ;;  %v647_v40 = vperm.slane %v344_v37, 2 }
  0x9c   :  { %v165_v9 = vsub.f32 0.0, %v136_v5  ;;  %v148_v10 = vsel %vm146_vm9, %v147_v6, %v145_v7  ;;  %v365_v63 = vperm.slane %v344_v37, 0 }
  0x9d   :  { %v166_v12 = vsub.f32 0.0, %v148_v10  ;;  %507 = vrot.lane.b32.xlu2 %v505_v39, %s995_s3 }
  0x9e   :  { %v168_v11 = vmul.f32 %v167_v8, %v165_v9 }
  0x9f   :  { %v169_v14 = vmul.f32 %v167_v8, %v166_v12 }
  0xa0   :  { %v170_v13 = vmul.f32 1.442695, %v168_v11 }
  0xa1   :  { %v172_v18 = vmul.f32 1.442695, %v169_v14 }
  0xa2   :  { %925 = vpow2.f32 %v170_v13 }
  0xa3   :  { %927 = vpow2.f32 %v172_v18 }
  0xa5   :  { %649 = vrot.lane.b32.xlu2 %v647_v40, %s996_s16 }
  0xa8   :  { %v926_v19 = vpop.eup %925 }
  0xa9   :  { %v928_v23 = vpop.eup %927 }
  0xe3   :  { %v196_v24 = vpop.permute.xlu2 %195 }
  0xe4   :  { %v199_v25 = vmul.f32 %v928_v23, %v196_v24 }
  0xe9   :  { %v191_v20 = vpop.permute.xlu1 %190 }
  0xea   :  { %v198_v21 = vmul.f32 %v926_v19, %v191_v20 }
  0xec   :  { %200 = vxpose.xlu1.b32.start [1/2] (short) (narrow) %v198_v21, 24 }
  0xf4   :  { %201 = vxpose.xlu1.b32.end [2/2] (short) (narrow) %v199_v25, 24 }
  0xf7   :  { %v508_v45 = vpop.permute.xlu2 %507 }
  0xfd   :  { %v911_v26 = vpop.permute.xlu0 %910 }
  0xfe   :  { %v912_v27 = vunpack.i.l.bf16 %v911_v26  ;;  %v913_v29 = vunpack.i.h.bf16 %v911_v26 }
  0xff   :  { %v650_v51 = vpop.permute.xlu2 %649 }
 0x100   :  { %v275_v28 = vmul.f32 %v926_v19, %v912_v27  ;;  %v276_v30 = vmul.f32 %v928_v23, %v913_v29 }
 0x102   :  { %277 = vxpose.xlu0.b32.start [1/2] (short) (narrow) %v275_v28, 24 }
 0x10a   :  { %278 = vxpose.xlu0.b32.end [2/2] (short) (narrow) %v276_v30, 24 }
 0x10c   :  { %v73_v31 = vpop.f32.mrf.mxu0 }
 0x10d   :  { %v74_v34 = vadd.f32 %v917_v32, %v73_v31 }
 0x114   :  { %v76_v33 = vpop.f32.mrf.mxu0 }
 0x115   :  { %v77_v35 = vadd.f32 %v917_v32, %v76_v33 }
 0x117   :  { %255 = vmatpush.msra.mxu1 %v77_v35  ;;  %332 = vmatpush.msra.mxu2 %v77_v35 }
 0x119   :  { %256 = vmatpush.msra.mxu1 %v74_v34  ;;  %333 = vmatpush.msra.mxu2 %v74_v34 }
 0x171   :  { %916 = vset.pattern.permute.xlu0 %v992_v4 }
 0x190   :  { %v216_v36 = vpop.trf.xlu1 }
 0x191   :  { %881 = vmatmul.msk.f32.vlgmr.msra.gmra.mxu1 %vm49_vm10, %v216_v36 }
 0x198   :  { %v217_v38 = vpop.trf.xlu1 }
 0x199   :  { %882 = vmatmul.msk.f32.gmra.mxu1 %vm49_vm10, %v217_v38 }
 0x1a0   :  { %v218_v41 = vpop.trf.xlu1 }
 0x1a1   :  { %883 = vmatmul.msk.f32.gmra.mxu1 %vm49_vm10, %v218_v41 }
 0x1a6   :  { %v293_v4 = vpop.trf.xlu0 }
 0x1a7   :  { %884 = vmatmul.msk.f32.vlgmr.msra.gmra.mxu2 %vm49_vm10, %v293_v4 }
 0x1ae   :  { %v294_v42 = vpop.trf.xlu0 }
 0x1af   :  { %885 = vmatmul.msk.f32.gmra.mxu2 %vm49_vm10, %v294_v42 }
 0x1b6   :  { %v295_v43 = vpop.trf.xlu0 }
 0x1b7   :  { %886 = vmatmul.msk.f32.gmra.mxu2 %vm49_vm10, %v295_v43 }
 0x20e   :  { %v1105_v44 = vpop.f32.mrf.mxu1 }
 0x20f   :  { %v366_v1 = vmul.f32 %v365_v63, %v1105_v44 }
 0x211   :  { %v368_v2 = vsel %vm367_vm11, %v366_v1, 0.0 }
 0x216   :  { %v1107_v46 = vpop.f32.mrf.mxu1 }
 0x217   :  { %v510_v47 = vmul.f32 %v508_v45, %v1107_v46 }
 0x219   :  { %512 = vrot.lane.b32.xlu2 %v510_v47, %s997_s5 }
 0x21e   :  { %v1117_v52 = vpop.f32.mrf.mxu1 }
 0x21f   :  { %v652_v53 = vmul.f32 %v650_v51, %v1117_v52 }
 0x22a   :  { %v1111_v48 = vpop.f32.mrf.mxu2 }
 0x22b   :  { %v396_v3 = vmul.f32 %v365_v63, %v1111_v48 }
 0x22d   :  { %v397_v5 = vsel %vm367_vm11, %v396_v3, 0.0 }
 0x232   :  { %v1113_v49 = vpop.f32.mrf.mxu2 }
 0x233   :  { %v544_v50 = vmul.f32 %v508_v45, %v1113_v49 }
 0x235   :  { %546 = vrot.lane.b32.xlu2 %v544_v50, %s997_s5 }
 0x23a   :  { %v1121_v54 = vpop.f32.mrf.mxu2 }
 0x23b   :  { %v686_v55 = vmul.f32 %v650_v51, %v1121_v54 }
 0x23d   :  { %654 = vrot.lane.b32.xlu2 %v652_v53, %s996_s16 }
 0x245   :  { %688 = vrot.lane.b32.xlu2 %v686_v55, %s996_s16 }
 0x273   :  { %v513_v56 = vpop.permute.xlu2 %512 }
 0x274   :  { %v515_v57 = vsel %vm367_vm11, %v513_v56, 0.0 }
 0x275   :  { %516 = vadd.xlane.f32.xlu0 %v515_v57 }
 0x28f   :  { %v547_v58 = vpop.permute.xlu2 %546 }
 0x290   :  { %v549_v59 = vsel %vm367_vm11, %v547_v58, 0.0 }
 0x291   :  { %550 = vadd.xlane.f32.xlu2 %v549_v59 }
 0x297   :  { %v655_v60 = vpop.permute.xlu2 %654 }
 0x298   :  { %v657_v61 = vsel %vm367_vm11, %v655_v60, 0.0 }
 0x299   :  { %658 = vadd.xlane.f32.xlu1 %v657_v61 }
 0x29f   :  { %v689_v62 = vpop.permute.xlu2 %688 }
 0x2a0   :  { %v691_v0 = vsel %vm367_vm11, %v689_v62, 0.0 }
 0x2a1   :  { %692 = vadd.xlane.f32.xlu2 %v691_v0 }
 0x2a9   :  { %369 = vadd.xlane.f32.xlu2 %v368_v2 }
 0x2b1   :  { %398 = vadd.xlane.f32.xlu2 %v397_v5 }
 0x2e8   :  { %v517_v6 = vpop.xlane.xlu0 %516 }
 0x2e9   :  { %v518_v7 = vrot.slane %v517_v6, 4 }
 0x2eb   :  { %v519_v8 = vmax.f32 %v517_v6, %v518_v7 }
 0x2ed   :  { %v520_v9 = vrot.slane %v519_v8, 2 }
 0x2ef   :  { %v521_v10 = vmax.f32 %v519_v8, %v520_v9 }
 0x2f1   :  { %v522_v11 = vrot.slane %v521_v10, 1 }
 0x2f3   :  { %v523_v12 = vmax.f32 %v521_v10, %v522_v11 }
 0x2f5   :  { %v524_v13 = vsub.f32 %v517_v6, %v523_v12 }
 0x2f7   :  { %v525_v14 = vmul.f32 1.442695, %v524_v13 }
 0x2f9   :  { %929 = vpow2.f32 %v525_v14 }
 0x2ff   :  { %v930_v15 = vpop.eup %929 }
 0x300   :  { %v527_v16 = vrot.slane %v930_v15, 4 }
 0x302   :  { %v528_v17 = vadd.f32 %v930_v15, %v527_v16 }
 0x304   :  { %v529_v18 = vrot.slane %v528_v17, 2  ;;  %v551_v19 = vpop.xlane.xlu2 %550 }
 0x305   :  { %v552_v20 = vrot.slane %v551_v19, 4 }
 0x306   :  { %v530_v22 = vadd.f32 %v529_v18, %v528_v17 }
 0x307   :  { %v553_v21 = vmax.f32 %v551_v19, %v552_v20 }
 0x308   :  { %v531_v25 = vrot.slane %v530_v22, 1 }
 0x309   :  { %v554_v23 = vrot.slane %v553_v21, 2 }
 0x30a   :  { %v532_v31 = vadd.f32 %v531_v25, %v530_v22 }
 0x30b   :  { %v555_v24 = vmax.f32 %v553_v21, %v554_v23 }
 0x30c   :  { %v659_v26 = vpop.xlane.xlu1 %658  ;;  %931 = vrcp.f32 %v532_v31 }
 0x30d   :  { %v556_v27 = vrot.slane %v555_v24, 1  ;;  %v660_v28 = vrot.slane %v659_v26, 4 }
 0x30f   :  { %v557_v29 = vmax.f32 %v555_v24, %v556_v27  ;;  %v661_v30 = vmax.f32 %v659_v26, %v660_v28 }
 0x311   :  { %v558_v32 = vsub.f32 %v551_v19, %v557_v29  ;;  %v662_v33 = vrot.slane %v661_v30, 2 }
 0x312   :  { %v932_v42 = vpop.eup %931 }
 0x313   :  { %v559_v34 = vmul.f32 1.442695, %v558_v32  ;;  %v663_v35 = vmax.f32 %v661_v30, %v662_v33  ;;  %v534_v57 = vmul.f32 %v932_v42, %v930_v15 }
 0x314   :  { %v693_v36 = vpop.xlane.xlu2 %692 }
 0x315   :  { %933 = vpow2.f32 %v559_v34  ;;  %v664_v37 = vrot.slane %v663_v35, 1  ;;  %v694_v38 = vrot.slane %v693_v36, 4  ;;  %v535_v0 = vmul.f32 %v534_v57, %v1107_v46 }
 0x317   :  { %v665_v39 = vmax.f32 %v663_v35, %v664_v37  ;;  %v695_v40 = vmax.f32 %v693_v36, %v694_v38  ;;  %v537_v11 = vsel %vm536_vm12, %v535_v0, 0.0  ;;  %v348_v35 = vld [vmem:[%s1247_s6 + $0x18] sm:$0xff] }
 0x318   :  { %v538_v17 = vrot.slane %v537_v11, 4  ;;  %443 = vmatpush.msra.mxu3 %v348_v35 }
 0x319   :  { %v666_v41 = vsub.f32 %v659_v26, %v665_v39  ;;  %v696_v4 = vrot.slane %v695_v40, 2 }
 0x31a   :  { %v539_v25 = vadd.f32 %v538_v17, %v537_v11 }
 0x31b   :  { %v934_v43 = vpop.eup %933  ;;  %v667_v45 = vmul.f32 1.442695, %v666_v41  ;;  %v697_v47 = vmax.f32 %v695_v40, %v696_v4  ;;  %v346_v41 = vld [vmem:[%s1247_s6 + $0x8] sm:$0xff] }
 0x31c   :  { %v561_v50 = vrot.slane %v934_v43, 4  ;;  %v370_v51 = vpop.xlane.xlu2 %369  ;;  %v540_v33 = vrot.slane %v539_v25, 2 }
 0x31d   :  { %935 = vpow2.f32 %v667_v45  ;;  %v698_v53 = vrot.slane %v697_v47, 1  ;;  %v371_v55 = vrot.slane %v370_v51, 4  ;;  %v345_v45 = vld [vmem:[%s1247_s6] sm:$0xff] }
 0x31e   :  { %v562_v56 = vadd.f32 %v934_v43, %v561_v50 }
 0x31f   :  { %v699_v58 = vmax.f32 %v697_v47, %v698_v53  ;;  %v372_v59 = vmax.f32 %v370_v51, %v371_v55 }
 0x320   :  { %v563_v60 = vrot.slane %v562_v56, 2 }
 0x321   :  { %v700_v61 = vsub.f32 %v693_v36, %v699_v58  ;;  %v373_v62 = vrot.slane %v372_v59, 2  ;;  %v347_v36 = vld [vmem:[%s1247_s6 + $0x10] sm:$0xff] }
 0x322   :  { %v564_v63 = vadd.f32 %v563_v60, %v562_v56  ;;  %444 = vmatpush.msra.mxu3 %v347_v36 }
 0x323   :  { %v936_v1 = vpop.eup %935  ;;  %v701_v2 = vmul.f32 1.442695, %v700_v61  ;;  %v374_v3 = vmax.f32 %v372_v59, %v373_v62 }
 0x324   :  { %v565_v5 = vrot.slane %v564_v63, 1  ;;  %v669_v6 = vrot.slane %v936_v1, 4  ;;  %v399_v7 = vpop.xlane.xlu2 %398  ;;  %445 = vmatpush.msra.mxu3 %v346_v41 }
 0x325   :  { %937 = vpow2.f32 %v701_v2  ;;  %v375_v8 = vrot.slane %v374_v3, 1  ;;  %v400_v9 = vrot.slane %v399_v7, 4 }
 0x326   :  { %v670_v10 = vadd.f32 %v936_v1, %v669_v6  ;;  %v566_v12 = vadd.f32 %v565_v5, %v564_v63  ;;  %446 = vmatpush.msra.mxu3 %v345_v45 }
 0x327   :  { %v376_v13 = vmax.f32 %v374_v3, %v375_v8  ;;  %v401_v14 = vmax.f32 %v399_v7, %v400_v9 }
 0x328   :  { %v671_v15 = vrot.slane %v670_v10, 2  ;;  %939 = vrcp.f32 %v566_v12 }
 0x329   :  { %v377_v16 = vsub.f32 %v370_v51, %v376_v13  ;;  %v402_v46 = vrot.slane %v401_v14, 2 }
 0x32a   :  { %v672_v18 = vadd.f32 %v671_v15, %v670_v10  ;;  %v351_v15 = vld [vmem:[%s1247_s6 + $0x30] sm:$0xff] }
 0x32b   :  { %v938_v19 = vpop.eup %937  ;;  %v378_v20 = vmul.f32 1.442695, %v377_v16  ;;  %v403_v21 = vmax.f32 %v401_v14, %v402_v46  ;;  %v352_v14 = vld [vmem:[%s1247_s6 + $0x38] sm:$0xff] }
 0x32c   :  { %v673_v22 = vrot.slane %v672_v18, 1  ;;  %v703_v23 = vrot.slane %v938_v19, 4  ;;  %596 = vmatpush.msrb.mxu3 %v352_v14 }
 0x32d   :  { %941 = vpow2.f32 %v378_v20  ;;  %v404_v24 = vrot.slane %v403_v21, 1 }
 0x32e   :  { %v940_v26 = vpop.eup %939  ;;  %v704_v27 = vadd.f32 %v938_v19, %v703_v23  ;;  %v674_v28 = vadd.f32 %v673_v22, %v672_v18  ;;  %v350_v18 = vld [vmem:[%s1247_s6 + $0x28] sm:$0xff]  ;;  %597 = vmatpush.msrb.mxu3 %v351_v15  ;;  %v998_v15 = vmov 16.0  }
 0x32f   :  { %v405_v29 = vmax.f32 %v403_v21, %v404_v24  ;;  %v568_v30 = vmul.f32 %v940_v26, %v934_v43  ;;  %v541_v43 = vadd.f32 %v540_v33, %v539_v25 }
 0x330   :  { %v705_v31 = vrot.slane %v704_v27, 2  ;;  %943 = vrcp.f32 %v674_v28  ;;  %598 = vmatpush.msrb.mxu3 %v350_v18 }
 0x331   :  { %v406_v32 = vsub.f32 %v399_v7, %v405_v29  ;;  %v569_v34 = vmul.f32 %v568_v30, %v1113_v49  ;;  %v542_v58 = vrot.slane %v541_v43, 1 }
 0x332   :  { %v706_v37 = vadd.f32 %v705_v31, %v704_v27 }
 0x333   :  { %v942_v38 = vpop.eup %941  ;;  %v407_v39 = vmul.f32 1.442695, %v406_v32  ;;  %v570_v40 = vsel %vm536_vm12, %v569_v34, 0.0  ;;  %v543_v6 = vadd.f32 %v542_v58, %v541_v43 }
 0x334   :  { %v707_v4 = vrot.slane %v706_v37, 1  ;;  %v380_v49 = vrot.slane %v942_v38, 4  ;;  %v571_v42 = vrot.slane %v570_v40, 4 }
 0x335   :  { %945 = vpow2.f32 %v407_v39 }
 0x336   :  { %v944_v47 = vpop.eup %943  ;;  %v381_v50 = vadd.f32 %v942_v38, %v380_v49  ;;  %v572_v51 = vadd.f32 %v571_v42, %v570_v40  ;;  %v708_v53 = vadd.f32 %v707_v4, %v706_v37 }
 0x337   :  { %v676_v55 = vmul.f32 %v944_v47, %v936_v1 }
 0x338   :  { %v382_v56 = vrot.slane %v381_v50, 2  ;;  %v573_v57 = vrot.slane %v572_v51, 2  ;;  %947 = vrcp.f32 %v708_v53 }
 0x339   :  { %v677_v59 = vmul.f32 %v676_v55, %v1117_v52  ;;  %v355_v55 = vld [vmem:[%s1247_s6 + $0x50] sm:$0xff] }
 0x33a   :  { %v383_v60 = vadd.f32 %v382_v56, %v381_v50  ;;  %v574_v61 = vadd.f32 %v573_v57, %v572_v51  ;;  %v354_v56 = vld [vmem:[%s1247_s6 + $0x48] sm:$0xff]  ;;  %v353_v57 = vld [vmem:[%s1247_s6 + $0x40] sm:$0xff] }
 0x33b   :  { %v946_v62 = vpop.eup %945  ;;  %v679_v63 = vsel %vm678_vm13, %v677_v59, 0.0 }
 0x33c   :  { %v384_v0 = vrot.slane %v383_v60, 1  ;;  %v409_v2 = vrot.slane %v946_v62, 4  ;;  %v575_v3 = vrot.slane %v574_v61, 1  ;;  %v680_v5 = vrot.slane %v679_v63, 4 }
 0x33e   :  { %v948_v1 = vpop.eup %947  ;;  %v410_v7 = vadd.f32 %v946_v62, %v409_v2  ;;  %v576_v8 = vadd.f32 %v575_v3, %v574_v61  ;;  %v681_v9 = vadd.f32 %v680_v5, %v679_v63  ;;  %v385_v10 = vadd.f32 %v384_v0, %v383_v60  ;;  %v1192_v60 = vld [vmem:[%s1248_s7] sm:$0xff] }
 0x33f   :  { %v710_v11 = vmul.f32 %v948_v1, %v938_v19  ;;  %v427_v61 = vperm.slane %v1192_v60, 0  ;;  %v578_v5 = vperm.slane %v1192_v60, 1 }
 0x340   :  { %v411_v12 = vrot.slane %v410_v7, 2  ;;  %v577_v52 = vsel %vm425_vm14, %v543_v6, %v576_v8  ;;  %949 = vrcp.f32 %v385_v10  ;;  %v682_v46 = vrot.slane %v681_v9, 2 }
 0x341   :  { %580 = vrot.lane.b32.xlu2 %v577_v52, %s997_s5  ;;  %v711_v13 = vmul.f32 %v710_v11, %v1121_v54  ;;  %v349_v54 = vld [vmem:[%s1247_s6 + $0x20] sm:$0xff]  ;;  %v720_v10 = vperm.slane %v1192_v60, 2 }
 0x342   :  { %v412_v16 = vadd.f32 %v411_v12, %v410_v7  ;;  %v683_v22 = vadd.f32 %v682_v46, %v681_v9  ;;  %599 = vmatpush.msrb.mxu3 %v349_v54 }
 0x343   :  { %v712_v17 = vsel %vm678_vm13, %v711_v13, 0.0  ;;  %vm816_vm13 = vcmask 1043456  }
 0x344   :  { %v413_v19 = vrot.slane %v412_v16, 1  ;;  %v713_v20 = vrot.slane %v712_v17, 4  ;;  %v684_v28 = vrot.slane %v683_v22, 1 }
 0x346   :  { %v950_v21 = vpop.eup %949  ;;  %v714_v23 = vadd.f32 %v713_v20, %v712_v17  ;;  %v414_v24 = vadd.f32 %v413_v19, %v412_v16  ;;  %v685_v34 = vadd.f32 %v684_v28, %v683_v22 }
 0x347   :  { %v387_v25 = vmul.f32 %v950_v21, %v942_v38 }
 0x348   :  { %v715_v26 = vrot.slane %v714_v23, 2  ;;  %951 = vrcp.f32 %v414_v24 }
 0x349   :  { %v388_v27 = vmul.f32 %v387_v25, %v1105_v44  ;;  %953 = vrcp.f32 %v998_v15 }
 0x34a   :  { %v716_v29 = vadd.f32 %v715_v26, %v714_v23 }
 0x34b   :  { %v389_v30 = vsel %vm367_vm11, %v388_v27, 0.0 }
 0x34c   :  { %v717_v31 = vrot.slane %v716_v29, 1  ;;  %v390_v32 = vrot.slane %v389_v30, 4 }
 0x34e   :  { %v952_v33 = vpop.eup %951  ;;  %v718_v35 = vadd.f32 %v717_v31, %v716_v29  ;;  %v391_v36 = vadd.f32 %v390_v32, %v389_v30 }
 0x34f   :  { %v416_v37 = vmul.f32 %v952_v33, %v946_v62  ;;  %v954_v16 = vpop.eup %953 }
 0x350   :  { %v719_v39 = vsel %vm425_vm14, %v685_v34, %v718_v35  ;;  %v392_v40 = vrot.slane %v391_v36, 2  ;;  %v459_v46 = vmul.f32 16.0, %v954_v16  ;;  %vm463_vm3 = vweird.f32 %v954_v16 }
 0x351   :  { %722 = vrot.lane.b32.xlu2 %v719_v39, %s996_s16  ;;  %v417_v38 = vmul.f32 %v416_v37, %v1111_v48  ;;  %v356_v48 = vld [vmem:[%s1247_s6 + $0x58] sm:$0xff] }
 0x352   :  { %v393_v4 = vadd.f32 %v392_v40, %v391_v36  ;;  %738 = vmatpush.msrb.mxu0 %v356_v48  ;;  %v460_v17 = vsub.f32 1.0, %v459_v46 }
 0x353   :  { %v418_v44 = vsel %vm367_vm11, %v417_v38, 0.0 }
 0x354   :  { %v419_v41 = vrot.slane %v418_v44, 4  ;;  %v394_v43 = vrot.slane %v393_v4, 1  ;;  %739 = vmatpush.msrb.mxu0 %v355_v55  ;;  %v461_v18 = vmul.f32 %v954_v16, %v460_v17 }
 0x356   :  { %v420_v49 = vadd.f32 %v419_v41, %v418_v44  ;;  %v395_v50 = vadd.f32 %v394_v43, %v393_v4  ;;  %740 = vmatpush.msrb.mxu0 %v354_v56  ;;  %v462_v19 = vadd.f32 %v954_v16, %v461_v18  ;;  %v358_v43 = vld [vmem:[%s1248_s7 + $0x8] sm:$0xf] }
 0x358   :  { %v421_v42 = vrot.slane %v420_v49, 2  ;;  %741 = vmatpush.msrb.mxu0 %v353_v57  ;;  %v464_v20 = vsel %vm463_vm3, %v954_v16, %v462_v19  ;;  %v771_v19 = vperm.slane %v1192_v60, 5 }
 0x35a   :  { %v422_v45 = vadd.f32 %v421_v42, %v420_v49  ;;  %v484_v49 = vperm.slane %v1192_v60, 3 }
 0x35c   :  { %v423_v47 = vrot.slane %v422_v45, 1 }
 0x35e   :  { %v424_v51 = vadd.f32 %v423_v47, %v422_v45  ;;  %v486_v47 = vperm.slane %v1192_v60, 6 }
 0x360   :  { %v426_v53 = vsel %vm425_vm14, %v395_v50, %v424_v51  ;;  %v488_v51 = vperm.slane %v358_v43, 1 }
 0x361   :  { %887 = vmatmul.msk.f32.vlgmr.msra.gmra.mxu3 %vm367_vm11, %v426_v53 }
 0x39b   :  { %v581_v58 = vpop.permute.xlu2 %580 }
 0x39c   :  { %888 = vmatmul.msk.f32.vlgmr.msrb.gmra.mxu3 %vm367_vm11, %v581_v58 }
 0x3ab   :  { %v723_v59 = vpop.permute.xlu2 %722 }
 0x3ac   :  { %889 = vmatmul.msk.f32.vlgmr.msrb.gmra.mxu0 %vm367_vm11, %v723_v59 }
 0x3e4   :  { %v448_v62 = vpop.f32.mrf.mxu3 }
 0x3e5   :  { %v449_v63 = vadd.f32 %v448_v62, %v427_v61 }
 0x3e7   :  { %v452_v0 = vmul.f32 0.2, %v449_v63  ;;  %vm451_vm15 = vcmp.ge.f32.partialorder %v449_v63, 0.0 }
 0x3e9   :  { %v453_v2 = vsel %vm451_vm15, %v449_v63, %v452_v0 }
 0x3ea   :  { %v455_v3 = vsel %vm454_vm0, %v453_v2, 0.0 }
 0x3eb   :  { %456 = vadd.xlane.f32.xlu2 %v455_v3 }
 0x41f   :  { %v601_v6 = vpop.f32.mrf.mxu3 }
 0x420   :  { %v602_v1 = vadd.f32 %v601_v6, %v578_v5 }
 0x422   :  { %v605_v7 = vmul.f32 0.2, %v602_v1  ;;  %vm604_vm1 = vcmp.ge.f32.partialorder %v602_v1, 0.0 }
 0x424   :  { %v606_v8 = vsel %vm604_vm1, %v602_v1, %v605_v7  ;;  %v629_v7 = vperm.slane %v1192_v60, 4 }
 0x425   :  { %v607_v9 = vsel %vm454_vm0, %v606_v8, 0.0 }
 0x426   :  { %608 = vadd.xlane.f32.xlu0 %v607_v9 }
 0x429   :  { %v743_v11 = vpop.f32.mrf.mxu0 }
 0x42a   :  { %v744_v12 = vadd.f32 %v743_v11, %v720_v10  ;;  %v631_v11 = vperm.slane %v1192_v60, 7 }
 0x42c   :  { %v747_v52 = vmul.f32 0.2, %v744_v12  ;;  %vm746_vm2 = vcmp.ge.f32.partialorder %v744_v12, 0.0 }
 0x42e   :  { %v748_v13 = vsel %vm746_vm2, %v744_v12, %v747_v52  ;;  %vm812_vm2 = vcmask 31744  }
 0x42f   :  { %v749_v14 = vsel %vm454_vm0, %v748_v13, 0.0 }
 0x430   :  { %750 = vadd.xlane.f32.xlu1 %v749_v14 }
 0x45e   :  { %v457_v54 = vpop.xlane.xlu2 %456 }
 0x45f   :  { %v465_v21 = vmul.f32 %v464_v20, %v457_v54 }
 0x461   :  { %v466_v22 = vsub.f32 %v453_v2, %v465_v21  ;;  %v773_v21 = vperm.slane %v358_v43, 0 }
 0x463   :  { %v467_v23 = vmul.f32 %v466_v22, %v466_v22 }
 0x465   :  { %v468_v24 = vsel %vm454_vm0, %v467_v23, 0.0  ;;  %v775_v23 = vperm.slane %v358_v43, 3 }
 0x466   :  { %469 = vadd.xlane.f32.xlu0 %v468_v24 }
 0x499   :  { %v609_v25 = vpop.xlane.xlu0 %608 }
 0x49a   :  { %v610_v26 = vmul.f32 %v609_v25, %v464_v20 }
 0x49c   :  { %v611_v27 = vsub.f32 %v606_v8, %v610_v26 }
 0x49e   :  { %v612_v28 = vmul.f32 %v611_v27, %v611_v27 }
 0x4a0   :  { %v613_v29 = vsel %vm454_vm0, %v612_v28, 0.0 }
 0x4a1   :  { %614 = vadd.xlane.f32.xlu1 %v613_v29 }
 0x4a3   :  { %v751_v30 = vpop.xlane.xlu1 %750 }
 0x4a4   :  { %v752_v31 = vmul.f32 %v751_v30, %v464_v20 }
 0x4a6   :  { %v1202_v32 = vsub.f32 %v748_v13, %v752_v31  ;;  %v633_v13 = vperm.slane %v358_v43, 2 }
 0x4a8   :  { %v754_v33 = vmul.f32 %v1202_v32, %v1202_v32 }
 0x4aa   :  { %v755_v34 = vsel %vm454_vm0, %v754_v33, 0.0  ;;  %v360_v33 = vld [vmem:[%s1250_s9] sm:$0xff] }
 0x4ab   :  { %756 = vadd.xlane.f32.xlu0 %v755_v34  ;;  %v791_v34 = vadd.f32 1e-05, %v360_v33 }
 0x4ad   :  { %vm798_vm14 = vweird.f32 %v791_v34 }
 0x4d9   :  { %v470_v35 = vpop.xlane.xlu0 %469 }
 0x4da   :  { %v471_v36 = vmul.f32 %v470_v35, %v464_v20 }
 0x4dc   :  { %v472_v37 = vadd.f32 1e-05, %v471_v36  ;;  %v1228_v36 = vld [vmem:[%s1251_s10] sm:$0xff] }
 0x4dd   :  { %890 = vmatpush.msk.msra.mxu3 %vm816_vm13, %v1228_v36 }
 0x4de   :  { %955 = vrsqrt.f32 %v472_v37  ;;  %vm479_vm5 = vweird.f32 %v472_v37 }
 0x4e4   :  { %v956_v39 = vpop.eup %955 }
 0x4e5   :  { %v474_v38 = vmul.f32 %v956_v39, %v472_v37  ;;  %vm480_vm4 = vweird.f32 %v956_v39 }
 0x4e6   :  { %vm481_vm6 = vmor %vm479_vm5, %vm480_vm4 }
 0x4e7   :  { %v475_v40 = vmul.f32 %v956_v39, %v474_v38 }
 0x4e9   :  { %v476_v44 = vmul.f32 0.5, %v475_v40  ;;  %v502_v40 = vperm.slane %v360_v33, 0 }
 0x4eb   :  { %v477_v41 = vsub.f32 1.5, %v476_v44 }
 0x4ed   :  { %v478_v4 = vmul.f32 %v956_v39, %v477_v41 }
 0x4ef   :  { %v482_v42 = vsel %vm481_vm6, %v956_v39, %v478_v4  ;;  %v644_v4 = vperm.slane %v360_v33, 1  ;;  %vm859_vm6 = vcmask 25600  }
 0x4f0   :  { %v483_v45 = vmul.f32 %v482_v42, %v466_v22  ;;  %v363_v42 = vperm.slane %v360_v33, 3 }
 0x4f2   :  { %v485_v50 = vmul.f32 %v484_v49, %v483_v45 }
 0x4f4   :  { %v487_v53 = vadd.f32 %v486_v47, %v485_v50  ;;  %v786_v50 = vperm.slane %v360_v33, 2 }
 0x4f6   :  { %v489_v48 = vmul.f32 %v488_v51, %v487_v53 }
 0x4f8   :  { %v490_v55 = vsel %vm454_vm0, %v489_v48, 0.0 }
 0x4f9   :  { %491 = vadd.xlane.f32.xlu1 %v490_v55 }
 0x514   :  { %v615_v56 = vpop.xlane.xlu1 %614 }
 0x515   :  { %v616_v57 = vmul.f32 %v615_v56, %v464_v20  ;;  %v789_v56 = vperm.slane %v360_v33, 6 }
 0x517   :  { %v617_v58 = vadd.f32 1e-05, %v616_v57 }
 0x519   :  { %957 = vrsqrt.f32 %v617_v58  ;;  %vm624_vm8 = vweird.f32 %v617_v58 }
 0x51e   :  { %v757_v59 = vpop.xlane.xlu0 %756 }
 0x51f   :  { %v958_v61 = vpop.eup %957  ;;  %v758_v62 = vmul.f32 %v757_v59, %v464_v20 }
 0x520   :  { %v619_v63 = vmul.f32 %v958_v61, %v617_v58  ;;  %vm625_vm7 = vweird.f32 %v958_v61 }
 0x521   :  { %v759_v0 = vadd.f32 1e-05, %v758_v62  ;;  %vm626_vm9 = vmor %vm624_vm8, %vm625_vm7 }
 0x522   :  { %v620_v2 = vmul.f32 %v958_v61, %v619_v63 }
 0x523   :  { %959 = vrsqrt.f32 %v759_v0  ;;  %vm766_vm11 = vweird.f32 %v759_v0 }
 0x524   :  { %v621_v3 = vmul.f32 0.5, %v620_v2  ;;  %961 = vrsqrt.f32 %v791_v34 }
 0x526   :  { %v622_v5 = vsub.f32 1.5, %v621_v3 }
 0x528   :  { %v623_v6 = vmul.f32 %v958_v61, %v622_v5 }
 0x529   :  { %v960_v1 = vpop.eup %959 }
 0x52a   :  { %v627_v8 = vsel %vm626_vm9, %v958_v61, %v623_v6  ;;  %v761_v9 = vmul.f32 %v960_v1, %v759_v0  ;;  %vm767_vm10 = vweird.f32 %v960_v1  ;;  %v962_v35 = vpop.eup %961  ;;  %v804_v61 = vperm.slane %v360_v33, 4 }
 0x52b   :  { %v628_v10 = vmul.f32 %v627_v8, %v611_v27  ;;  %vm768_vm12 = vmor %vm766_vm11, %vm767_vm10  ;;  %v918_v27 = vld [vmem:[%s1249_s8] ss:$0 sm:$0xff]  ;;  %v793_v37 = vmul.f32 %v962_v35, %v791_v34  ;;  %vm799_vm15 = vweird.f32 %v962_v35  ;;  %v806_v0 = vperm.slane %v360_v33, 5 }
 0x52c   :  { %v762_v12 = vmul.f32 %v960_v1, %v761_v9 }
 0x52d   :  { %v630_v52 = vmul.f32 %v629_v7, %v628_v10  ;;  %v794_v39 = vmul.f32 %v962_v35, %v793_v37 }
 0x52e   :  { %v763_v14 = vmul.f32 0.5, %v762_v12 }
 0x52f   :  { %v632_v15 = vadd.f32 %v631_v11, %v630_v52  ;;  %v795_v38 = vmul.f32 0.5, %v794_v39 }
 0x530   :  { %v764_v16 = vsub.f32 1.5, %v763_v14 }
 0x531   :  { %v634_v46 = vmul.f32 %v633_v13, %v632_v15  ;;  %v796_v41 = vsub.f32 1.5, %v795_v38  ;;  %v811_v13 = vperm.slane %v1228_v36, 4  ;;  %v840_v15 = vperm.slane %v1228_v36, 7 }
 0x532   :  { %v765_v17 = vmul.f32 %v960_v1, %v764_v16 }
 0x533   :  { %v635_v18 = vsel %vm454_vm0, %v634_v46, 0.0  ;;  %v797_v45 = vmul.f32 %v962_v35, %v796_v41 }
 0x534   :  { %v769_v20 = vsel %vm768_vm12, %v960_v1, %v765_v17  ;;  %636 = vadd.xlane.f32.xlu2 %v635_v18  ;;  %v362_v1 = vld [vmem:[%s1251_s10 + $0x8] sm:$0x1]  ;;  %s999_s10 = smov [#allocation2]  }
 0x535   :  { %v770_v54 = vmul.f32 %v769_v20, %v1202_v32  ;;  %v842_v7 = vadd.f32 1e-05, %v362_v1  ;;  %s866_s24 = sshll.u32 %s999_s10, 4  ;;  %s867_s24 = int_to_ptr.vmem [resolvable:$true] %s866_s24 }
 0x537   :  { %v772_v22 = vmul.f32 %v771_v19, %v770_v54  ;;  %963 = vrsqrt.f32 %v842_v7  ;;  %vm849_vm3 = vweird.f32 %v842_v7  ;;  %v855_v19 = vperm.slane %v1228_v36, 5 }
 0x538   :  { %v857_v54 = vperm.slane %v1228_v36, 6 }
 0x539   :  { %v774_v24 = vadd.f32 %v773_v21, %v772_v22 }
 0x53b   :  { %v776_v25 = vmul.f32 %v775_v23, %v774_v24 }
 0x53d   :  { %v777_v26 = vsel %vm454_vm0, %v776_v25, 0.0  ;;  %vm800_vm0 = vmor %vm798_vm14, %vm799_vm15  ;;  %v964_v8 = vpop.eup %963 }
 0x53e   :  { %778 = vadd.xlane.f32.xlu0 %v777_v26  ;;  %v801_v53 = vsel %vm800_vm0, %v962_v35, %v797_v45  ;;  %v844_v9 = vmul.f32 %v964_v8, %v842_v7  ;;  %vm850_vm4 = vweird.f32 %v964_v8 }
 0x53f   :  { %v802_v58 = vperm.slane %v801_v53, 7  ;;  %vm851_vm5 = vmor %vm849_vm3, %vm850_vm4 }
 0x540   :  { %v845_v10 = vmul.f32 %v964_v8, %v844_v9 }
 0x542   :  { %v846_v11 = vmul.f32 0.5, %v845_v10 }
 0x544   :  { %v847_v12 = vsub.f32 1.5, %v846_v11 }
 0x546   :  { %v848_v52 = vmul.f32 %v964_v8, %v847_v12 }
 0x548   :  { %v852_v14 = vsel %vm851_vm5, %v964_v8, %v848_v52 }
 0x549   :  { %v853_v17 = vperm.slane %v852_v14, 0 }
 0x56c   :  { %v492_v28 = vpop.xlane.xlu1 %491 }
 0x56d   :  { %v496_v29 = vadd.f32 %v918_v27, %v492_v28 }
 0x56f   :  { %499 = vperm.xlu1 %907, %v496_v29  }
 0x5a7   :  { %v637_v60 = vpop.xlane.xlu2 %636 }
 0x5a8   :  { %v638_v30 = vadd.f32 %v918_v27, %v637_v60 }
 0x5aa   :  { %641 = vperm.xlu2 %915, %v638_v30  }
 0x5b1   :  { %v779_v31 = vpop.xlane.xlu0 %778 }
 0x5b2   :  { %v780_v32 = vadd.f32 %v918_v27, %v779_v31 }
 0x5b4   :  { %783 = vperm.xlu0 %916, %v780_v32  }
 0x5e1   :  { %v500_v44 = vpop.permute.xlu1 %499 }
 0x5e2   :  { %v503_v43 = vmul.f32 %v502_v40, %v500_v44 }
 0x5e4   :  { %v504_v51 = vadd.f32 %v503_v43, %v363_v42 }
 0x604   :  { %v642_v49 = vpop.permute.xlu2 %641 }
 0x605   :  { %v645_v47 = vmul.f32 %v644_v4, %v642_v49 }
 0x607   :  { %v646_v55 = vadd.f32 %v645_v47, %v504_v51 }
 0x626   :  { %v784_v48 = vpop.permute.xlu0 %783 }
 0x627   :  { %v787_v57 = vmul.f32 %v786_v50, %v784_v48 }
 0x629   :  { %v788_v59 = vadd.f32 %v787_v57, %v646_v55 }
 0x62b   :  { %v790_v62 = vsub.f32 %v788_v59, %v789_v56 }
 0x62d   :  { %v803_v63 = vmul.f32 %v802_v58, %v790_v62 }
 0x62f   :  { %v805_v2 = vmul.f32 %v804_v61, %v803_v63 }
 0x631   :  { %v807_v3 = vadd.f32 %v806_v0, %v805_v2 }
 0x633   :  { %vm808_vm1 = vcmp.ge.f32.partialorder %v807_v3, 0.0  ;;  %v809_v5 = vmul.f32 0.2, %v807_v3 }
 0x635   :  { %v810_v6 = vsel %vm808_vm1, %v807_v3, %v809_v5 }
 0x636   :  { %891 = vmatmul.msk.f32.vlgmr.msra.gmra.mxu3 %vm812_vm2, %v810_v6 }
 0x6b9   :  { %v837_v16 = vpop.f32.mrf.mxu3 }
 0x6ba   :  { %v838_v46 = vadd.f32 %v837_v16, %v811_v13 }
 0x6bc   :  { %v841_v18 = vsub.f32 %v838_v46, %v840_v15 }
 0x6be   :  { %v854_v20 = vmul.f32 %v853_v17, %v841_v18 }
 0x6c0   :  { %v856_v21 = vmul.f32 %v855_v19, %v854_v20 }
 0x6c2   :  { %v858_v22 = vadd.f32 %v857_v54, %v856_v21 }
 0x6c4   :  { %860 = vst.msk [vmem:[#allocation2] sm:$0x3] %vm859_vm6, %v858_v22 }
 0x6c5   :  { %871 = dma.vmem_to_hbm [thread:$0]  %s867_s24, 32, %s869_s4, [#allocation3]  }
 0x6c6   :  { %989 = dma.done.wait [#allocation3], 32  }
 0x6c7   :  { %990 = vsyncadd [#allocation3], 4294967264 }
 0x6c8   :  { %876 = vsyncpa [#allocation3], 1 }

</bundles_post_ra>
